<compile_context>
chip_gen: v6e
topology: v6e:2x2x1
jax: 0.10.0
libtpu: 0.0.40
codegen_flags: <defaults>
</compile_context>

<pallas_src>
import functools

import jax
import jax.numpy as jnp
from jax.experimental import pallas as pl
from jax.experimental.pallas import tpu as pltpu


def _round_up(x, m):
    return -(-x // m) * m


def _resblock_kernel(*refs, stride, h_out, w_out, cin_p, cout_p, proj):
    """Fused ResidualBlock for one batch element (channel dims lane-padded).

    xph_ref  : (1, HP, WP, s*s*cin_p) bf16  padded input, phase-split channels
    w1_ref   : (9*cin_p, cout_p)  bf16      conv1 weights, BN1 scale folded in
    b1_ref   : (1, cout_p)        f32       folded BN1 bias
    w2_ref   : (9*cout_p, cout_p) bf16      conv2 weights, BN2 scale folded in
    b2_ref   : (1, cout_p)        f32       folded BN2 (+ shortcut BN) bias
    wsc_ref  : (cin_p, cout_p)    bf16      (proj only) 1x1 shortcut, BN folded
    o_ref    : (1, H_out*W_out, cout_p) f32
    out1p_ref: VMEM scratch (H_out+2, W_out+2, cout_p) bf16 (conv1 out + halo)
    """
    if proj:
        (xph_ref, w1_ref, b1_ref, w2_ref, b2_ref,
         wsc_ref, o_ref, out1p_ref) = refs
    else:
        xph_ref, w1_ref, b1_ref, w2_ref, b2_ref, o_ref, out1p_ref = refs
    s = stride
    hw = h_out * w_out

    # ---- conv1 (3x3, stride s) + folded BN + ReLU: one MXU matmul ----------
    taps = []
    for i in range(3):
        for j in range(3):
            ph = (i % s) * s + (j % s)          # stride-phase holding tap (i,j)
            taps.append(xph_ref[0,
                                i // s:i // s + h_out,
                                j // s:j // s + w_out,
                                ph * cin_p:(ph + 1) * cin_p])
    p1 = jnp.concatenate(taps, axis=-1).reshape(hw, 9 * cin_p)      # bf16
    out1 = jnp.dot(p1, w1_ref[...], preferred_element_type=jnp.float32)
    out1 = jnp.maximum(out1 + b1_ref[...], 0.0)                     # f32

    # ---- stash conv1 output with a 1-pixel zero halo (= conv2's padding) ---
    # Zeroed every step: scratch is per-core and the interior is rewritten,
    # but the halo must be zero on every core / every batch element.
    out1p_ref[...] = jnp.zeros(out1p_ref.shape, out1p_ref.dtype)
    out1p_ref[1:1 + h_out, 1:1 + w_out, :] = (
        out1.reshape(h_out, w_out, cout_p).astype(out1p_ref.dtype))

    # ---- conv2 (3x3, stride 1) + folded BN: 9 per-tap MXU matmuls ----------
    # (no (hw, 9*cout_p) concat temp; each tap already has K = cout_p >= 128)
    acc = jnp.zeros((hw, cout_p), jnp.float32)
    t = 0
    for i in range(3):
        for j in range(3):
            tap = out1p_ref[i:i + h_out, j:j + w_out, :].reshape(hw, cout_p)
            acc = acc + jnp.dot(tap, w2_ref[t * cout_p:(t + 1) * cout_p, :],
                                preferred_element_type=jnp.float32)
            t += 1
    acc = acc + b2_ref[...]          # BN2 bias (+ shortcut BN bias if proj)

    # ---- shortcut (identity, or 1x1 conv + folded BN) -----------------------
    ph = (1 % s) * s + (1 % s)       # phase holding the unpadded pixels
    off = 1 // s
    xs = xph_ref[0, off:off + h_out, off:off + w_out,
                 ph * cin_p:(ph + 1) * cin_p].reshape(hw, cin_p)
    if proj:
        acc = acc + jnp.dot(xs, wsc_ref[...],
                            preferred_element_type=jnp.float32)
    else:
        acc = acc + xs.astype(jnp.float32)

    o_ref[0] = jnp.maximum(acc, 0.0).astype(o_ref.dtype)


def residual_block(x_nchw, params, *, stride):
    """Forward pass of ResidualBlock.  x_nchw: (N,Cin,H,W) -> (N,Cout,H',W')."""
    n, cin, h, w = x_nchw.shape
    cout = params["w1"].shape[-1]
    proj = (stride != 1) or (cin != cout)
    s = stride
    h_out = (h - 1) // s + 1
    w_out = (w - 1) // s + 1
    hw = h_out * w_out
    cin_p = _round_up(cin, 128)      # lane-pad channels -> unmasked vregs
    cout_p = _round_up(cout, 128)

    # bf16 BEFORE any layout work (pad / phase split / transpose) to halve the
    # wrapper-side HBM traffic.  NCHW -> NHWC.
    x = jnp.transpose(x_nchw.astype(jnp.bfloat16), (0, 2, 3, 1))
    # Channel pad to lane width; spatial pad 1 for the first 3x3 conv.
    x = jnp.pad(x, ((0, 0), (1, 1), (1, 1), (0, cin_p - cin)))
    # Round spatial dims up to a multiple of s, then split into s*s
    # stride-phases stacked on the channel axis so the kernel only needs
    # unit-stride static slices to build conv taps.
    hp_e = _round_up(x.shape[1], s)
    wp_e = _round_up(x.shape[2], s)
    x = jnp.pad(x, ((0, 0), (0, hp_e - x.shape[1]),
                    (0, wp_e - x.shape[2]), (0, 0)))
    phases = [x[:, p::s, q::s, :] for p in range(s) for q in range(s)]
    xph = jnp.concatenate(phases, axis=-1) if len(phases) > 1 else phases[0]
    hp, wp, pc = xph.shape[1], xph.shape[2], xph.shape[3]

    # Fold BN scale into conv weights; zero-pad channel dims; biases stay f32.
    def pad4(wt, ci, co):
        return jnp.pad(wt, ((0, 0), (0, 0), (0, cin_p - ci if ci == cin else cout_p - ci),
                            (0, cout_p - co)))

    w1f = jnp.pad(params["w1"] * params["s1"],
                  ((0, 0), (0, 0), (0, cin_p - cin), (0, cout_p - cout)))
    w1f = w1f.reshape(9 * cin_p, cout_p).astype(jnp.bfloat16)
    w2f = jnp.pad(params["w2"] * params["s2"],
                  ((0, 0), (0, 0), (0, cout_p - cout), (0, cout_p - cout)))
    w2f = w2f.reshape(9 * cout_p, cout_p).astype(jnp.bfloat16)
    b1 = jnp.pad(params["b1"], (0, cout_p - cout)).reshape(1, cout_p)
    b1 = b1.astype(jnp.float32)
    b2_raw = params["b2"] + (params["bsc"] if proj else 0.0)   # one epilogue bias
    b2 = jnp.pad(b2_raw, (0, cout_p - cout)).reshape(1, cout_p).astype(jnp.float32)

    args = [xph, w1f, b1, w2f, b2]
    in_specs = [
        pl.BlockSpec((1, hp, wp, pc), lambda b: (b, 0, 0, 0)),
        pl.BlockSpec((9 * cin_p, cout_p), lambda b: (0, 0)),
        pl.BlockSpec((1, cout_p), lambda b: (0, 0)),
        pl.BlockSpec((9 * cout_p, cout_p), lambda b: (0, 0)),
        pl.BlockSpec((1, cout_p), lambda b: (0, 0)),
    ]
    if proj:
        wscf = (params["wsc"].reshape(cin, cout) * params["ssc"])
        wscf = jnp.pad(wscf, ((0, cin_p - cin), (0, cout_p - cout)))
        args.append(wscf.astype(jnp.bfloat16))
        in_specs.append(pl.BlockSpec((cin_p, cout_p), lambda b: (0, 0)))

    kernel = functools.partial(_resblock_kernel, stride=s, h_out=h_out,
                               w_out=w_out, cin_p=cin_p, cout_p=cout_p,
                               proj=proj)
    out = pl.pallas_call(
        kernel,
        out_shape=jax.ShapeDtypeStruct((n, hw, cout_p), jnp.float32),
        grid_spec=pltpu.PrefetchScalarGridSpec(
            num_scalar_prefetch=0,
            grid=(n,),
            in_specs=in_specs,
            out_specs=pl.BlockSpec((1, hw, cout_p), lambda b: (b, 0, 0)),
            scratch_shapes=[
                pltpu.VMEM((h_out + 2, w_out + 2, cout_p), jnp.bfloat16)],
        ),
        compiler_params=pltpu.CompilerParams(
            dimension_semantics=("parallel",),
            vmem_limit_bytes=32 * 1024 * 1024),
    )(*args)
    out = out.reshape(n, h_out, w_out, cout_p)[..., :cout]
    return jnp.transpose(out, (0, 3, 1, 2)).astype(jnp.float32)  # NHWC -> NCHW


def init_params(key, cin, cout, stride, eps=1e-5):
    """Deterministic synthetic parameters (shapes follow nn.Conv2d/BatchNorm2d)."""
    ks = jax.random.split(key, 8)

    def bn_fold(k, c):
        k1, k2, k3 = jax.random.split(k, 3)
        gamma = 1.0 + 0.1 * jax.random.normal(k1, (c,), jnp.float32)
        beta = 0.1 * jax.random.normal(k2, (c,), jnp.float32)
        mean = 0.1 * jax.random.normal(k3, (c,), jnp.float32)
        var = jnp.ones((c,), jnp.float32)
        sc = gamma / jnp.sqrt(var + eps)
        return sc, beta - mean * sc

    p = {}
    p["w1"] = 0.1 * jax.random.normal(ks[0], (3, 3, cin, cout), jnp.float32)
    p["w2"] = 0.1 * jax.random.normal(ks[1], (3, 3, cout, cout), jnp.float32)
    p["s1"], p["b1"] = bn_fold(ks[2], cout)
    p["s2"], p["b2"] = bn_fold(ks[3], cout)
    if stride != 1 or cin != cout:
        p["wsc"] = 0.1 * jax.random.normal(ks[4], (1, 1, cin, cout), jnp.float32)
        p["ssc"], p["bsc"] = bn_fold(ks[5], cout)
    return p


# ----------------------------- pure-JAX reference -----------------------------
def _ref_conv(x, w, stride, pad):
    return jax.lax.conv_general_dilated(
        x, w, window_strides=(stride, stride),
        padding=((pad, pad), (pad, pad)),
        dimension_numbers=("NHWC", "HWIO", "NHWC"),
        precision=jax.lax.Precision.HIGHEST)


def residual_block_ref(x_nchw, params, *, stride):
    x = jnp.transpose(x_nchw, (0, 2, 3, 1))
    cin = x.shape[-1]
    cout = params["w1"].shape[-1]
    out = _ref_conv(x, params["w1"], stride, 1) * params["s1"] + params["b1"]
    out = jnp.maximum(out, 0.0)
    out = _ref_conv(out, params["w2"], 1, 1) * params["s2"] + params["b2"]
    if stride != 1 or cin != cout:
        short = _ref_conv(x, params["wsc"], stride, 0) * params["ssc"] + params["bsc"]
    else:
        short = x
    out = jnp.maximum(out + short, 0.0)
    return jnp.transpose(out, (0, 3, 1, 2))


if __name__ == "__main__":
    key = jax.random.PRNGKey(0)
    kx, kp1, kp2 = jax.random.split(key, 3)

    # Case 1: stride=2, Cin != Cout  -> exercises the 1x1-conv+BN shortcut.
    N, Cin, H, W, Cout, stride = 2, 4, 16, 16, 8, 2
    x = jax.random.normal(kx, (N, Cin, H, W), jnp.float32)
    params = init_params(kp1, Cin, Cout, stride)
    y = jax.block_until_ready(residual_block(x, params, stride=stride))
    y_ref = jax.block_until_ready(residual_block_ref(x, params, stride=stride))
    assert y.shape == (N, Cout, H // stride, W // stride)
    # bf16 matmul operands / bf16 residual read with f32 accumulation.
    assert jnp.allclose(y, y_ref, rtol=3e-2, atol=3e-2), \
        float(jnp.max(jnp.abs(y - y_ref)))

    # Case 2: stride=1, Cin == Cout -> identity shortcut.
    params_id = init_params(kp2, Cin, Cin, 1)
    y2 = jax.block_until_ready(residual_block(x, params_id, stride=1))
    y2_ref = jax.block_until_ready(residual_block_ref(x, params_id, stride=1))
    assert y2.shape == (N, Cin, H, W)
    assert jnp.allclose(y2, y2_ref, rtol=3e-2, atol=3e-2), \
        float(jnp.max(jnp.abs(y2 - y2_ref)))

    print("KERNEL_OK")
</pallas_src>

<mosaic_0001>
module attributes {stable_mosaic.version = 11 : i64} {
  func.func @_resblock_kernel(%arg0: i32, %arg1: memref<1x9x9x512xbf16, #tpu.memory_space<vmem>>, %arg2: memref<1152x128xbf16, #tpu.memory_space<vmem>>, %arg3: memref<1x128xf32, #tpu.memory_space<vmem>>, %arg4: memref<1152x128xbf16, #tpu.memory_space<vmem>>, %arg5: memref<1x128xf32, #tpu.memory_space<vmem>>, %arg6: memref<128x128xbf16, #tpu.memory_space<vmem>>, %arg7: memref<1x64x128xf32, #tpu.memory_space<vmem>>, %arg8: memref<10x10x128xbf16, #tpu.memory_space<vmem>>) attributes {dimension_semantics = [#tpu.dimension_semantics<parallel>], iteration_bounds = array<i64: 2>, scalar_prefetch = 0 : i64, scratch_operands = 1 : i64, tpu.core_type = #tpu.core_type<tc>, window_params = [{transform_indices = @transform_0, window_bounds = array<i64: 1, 9, 9, 512>}, {pipeline_mode = #tpu.pipeline_mode<synchronous>, transform_indices = @transform_1, window_bounds = array<i64: 1152, 128>}, {pipeline_mode = #tpu.pipeline_mode<synchronous>, transform_indices = @transform_2, window_bounds = array<i64: 1, 128>}, {pipeline_mode = #tpu.pipeline_mode<synchronous>, transform_indices = @transform_3, window_bounds = array<i64: 1152, 128>}, {pipeline_mode = #tpu.pipeline_mode<synchronous>, transform_indices = @transform_4, window_bounds = array<i64: 1, 128>}, {pipeline_mode = #tpu.pipeline_mode<synchronous>, transform_indices = @transform_5, window_bounds = array<i64: 128, 128>}, {transform_indices = @transform_6, window_bounds = array<i64: 1, 64, 128>}]} {
    %c0 = arith.constant 0 : index
    %c0_0 = arith.constant 0 : index
    %c0_1 = arith.constant 0 : index
    %c0_2 = arith.constant 0 : index
    %0 = vector.load %arg1[%c0, %c0_0, %c0_1, %c0_2] : memref<1x9x9x512xbf16, #tpu.memory_space<vmem>>, vector<1x8x8x128xbf16>
    %1 = vector.shape_cast %0 : vector<1x8x8x128xbf16> to vector<8x8x128xbf16>
    %c0_3 = arith.constant 0 : index
    %c0_4 = arith.constant 0 : index
    %c0_5 = arith.constant 0 : index
    %c128 = arith.constant 128 : index
    %2 = vector.load %arg1[%c0_3, %c0_4, %c0_5, %c128] : memref<1x9x9x512xbf16, #tpu.memory_space<vmem>>, vector<1x8x8x128xbf16>
    %3 = vector.shape_cast %2 : vector<1x8x8x128xbf16> to vector<8x8x128xbf16>
    %c0_6 = arith.constant 0 : index
    %c0_7 = arith.constant 0 : index
    %c1 = arith.constant 1 : index
    %c0_8 = arith.constant 0 : index
    %4 = vector.load %arg1[%c0_6, %c0_7, %c1, %c0_8] : memref<1x9x9x512xbf16, #tpu.memory_space<vmem>>, vector<1x8x8x128xbf16>
    %5 = vector.shape_cast %4 : vector<1x8x8x128xbf16> to vector<8x8x128xbf16>
    %c0_9 = arith.constant 0 : index
    %c0_10 = arith.constant 0 : index
    %c0_11 = arith.constant 0 : index
    %c256 = arith.constant 256 : index
    %6 = vector.load %arg1[%c0_9, %c0_10, %c0_11, %c256] : memref<1x9x9x512xbf16, #tpu.memory_space<vmem>>, vector<1x8x8x128xbf16>
    %7 = vector.shape_cast %6 : vector<1x8x8x128xbf16> to vector<8x8x128xbf16>
    %c0_12 = arith.constant 0 : index
    %c0_13 = arith.constant 0 : index
    %c0_14 = arith.constant 0 : index
    %c384 = arith.constant 384 : index
    %8 = vector.load %arg1[%c0_12, %c0_13, %c0_14, %c384] : memref<1x9x9x512xbf16, #tpu.memory_space<vmem>>, vector<1x8x8x128xbf16>
    %9 = vector.shape_cast %8 : vector<1x8x8x128xbf16> to vector<8x8x128xbf16>
    %c0_15 = arith.constant 0 : index
    %c0_16 = arith.constant 0 : index
    %c1_17 = arith.constant 1 : index
    %c256_18 = arith.constant 256 : index
    %10 = vector.load %arg1[%c0_15, %c0_16, %c1_17, %c256_18] : memref<1x9x9x512xbf16, #tpu.memory_space<vmem>>, vector<1x8x8x128xbf16>
    %11 = vector.shape_cast %10 : vector<1x8x8x128xbf16> to vector<8x8x128xbf16>
    %c0_19 = arith.constant 0 : index
    %c1_20 = arith.constant 1 : index
    %c0_21 = arith.constant 0 : index
    %c0_22 = arith.constant 0 : index
    %12 = vector.load %arg1[%c0_19, %c1_20, %c0_21, %c0_22] : memref<1x9x9x512xbf16, #tpu.memory_space<vmem>>, vector<1x8x8x128xbf16>
    %13 = vector.shape_cast %12 : vector<1x8x8x128xbf16> to vector<8x8x128xbf16>
    %c0_23 = arith.constant 0 : index
    %c1_24 = arith.constant 1 : index
    %c0_25 = arith.constant 0 : index
    %c128_26 = arith.constant 128 : index
    %14 = vector.load %arg1[%c0_23, %c1_24, %c0_25, %c128_26] : memref<1x9x9x512xbf16, #tpu.memory_space<vmem>>, vector<1x8x8x128xbf16>
    %15 = vector.shape_cast %14 : vector<1x8x8x128xbf16> to vector<8x8x128xbf16>
    %c0_27 = arith.constant 0 : index
    %c1_28 = arith.constant 1 : index
    %c1_29 = arith.constant 1 : index
    %c0_30 = arith.constant 0 : index
    %16 = vector.load %arg1[%c0_27, %c1_28, %c1_29, %c0_30] : memref<1x9x9x512xbf16, #tpu.memory_space<vmem>>, vector<1x8x8x128xbf16>
    %17 = vector.shape_cast %16 : vector<1x8x8x128xbf16> to vector<8x8x128xbf16>
    %18 = tpu.concatenate %1, %3, %5, %7, %9, %11, %13, %15, %17 in 2 : vector<8x8x128xbf16>, vector<8x8x128xbf16>, vector<8x8x128xbf16>, vector<8x8x128xbf16>, vector<8x8x128xbf16>, vector<8x8x128xbf16>, vector<8x8x128xbf16>, vector<8x8x128xbf16>, vector<8x8x128xbf16> -> vector<8x8x1152xbf16>
    %19 = vector.shape_cast %18 : vector<8x8x1152xbf16> to vector<64x1152xbf16>
    %c0_31 = arith.constant 0 : index
    %c0_32 = arith.constant 0 : index
    %20 = vector.load %arg2[%c0_31, %c0_32] : memref<1152x128xbf16, #tpu.memory_space<vmem>>, vector<1152x128xbf16>
    %cst = arith.constant dense<0.000000e+00> : vector<64x128xf32>
    %21 = tpu.matmul %19, %20, %cst {dimension_numbers = #tpu.dot_dimension_numbers<[1], [0], [0], [1], [0, 0, 1, 1], [], []>} : vector<64x1152xbf16>, vector<1152x128xbf16>, vector<64x128xf32> -> vector<64x128xf32>
    %c0_33 = arith.constant 0 : index
    %c0_34 = arith.constant 0 : index
    %22 = vector.load %arg3[%c0_33, %c0_34] : memref<1x128xf32, #tpu.memory_space<vmem>>, vector<1x128xf32>
    %23 = vector.broadcast %22 : vector<1x128xf32> to vector<64x128xf32>
    %24 = arith.addf %21, %23 : vector<64x128xf32>
    %cst_35 = arith.constant 0.000000e+00 : f32
    %25 = vector.broadcast %cst_35 : f32 to vector<64x128xf32>
    %26 = arith.maximumf %24, %25 : vector<64x128xf32>
    %cst_36 = arith.constant 0.000000e+00 : bf16
    %27 = vector.broadcast %cst_36 : bf16 to vector<10x10x128xbf16>
    %c0_37 = arith.constant 0 : index
    %c0_38 = arith.constant 0 : index
    %c0_39 = arith.constant 0 : index
    %28 = vector.load %arg8[%c0_37, %c0_38, %c0_39] : memref<10x10x128xbf16, #tpu.memory_space<vmem>>, vector<10x10x128xbf16>
    tpu.vector_store %arg8[%c0_37, %c0_38, %c0_39], %27 {strides = array<i32>} : memref<10x10x128xbf16, #tpu.memory_space<vmem>>, vector<10x10x128xbf16>,
    %29 = vector.shape_cast %26 : vector<64x128xf32> to vector<8x8x128xf32>
    %30 = arith.truncf %29 : vector<8x8x128xf32> to vector<8x8x128xbf16>
    %c1_40 = arith.constant 1 : index
    %c1_41 = arith.constant 1 : index
    %c0_42 = arith.constant 0 : index
    %31 = vector.load %arg8[%c1_40, %c1_41, %c0_42] : memref<10x10x128xbf16, #tpu.memory_space<vmem>>, vector<8x8x128xbf16>
    tpu.vector_store %arg8[%c1_40, %c1_41, %c0_42], %30 {strides = array<i32>} : memref<10x10x128xbf16, #tpu.memory_space<vmem>>, vector<8x8x128xbf16>,
    %cst_43 = arith.constant 0.000000e+00 : f32
    %32 = vector.broadcast %cst_43 : f32 to vector<64x128xf32>
    %c0_44 = arith.constant 0 : index
    %c0_45 = arith.constant 0 : index
    %c0_46 = arith.constant 0 : index
    %33 = vector.load %arg8[%c0_44, %c0_45, %c0_46] : memref<10x10x128xbf16, #tpu.memory_space<vmem>>, vector<8x8x128xbf16>
    %34 = vector.shape_cast %33 : vector<8x8x128xbf16> to vector<64x128xbf16>
    %c0_47 = arith.constant 0 : index
    %c0_48 = arith.constant 0 : index
    %35 = vector.load %arg4[%c0_47, %c0_48] : memref<1152x128xbf16, #tpu.memory_space<vmem>>, vector<128x128xbf16>
    %cst_49 = arith.constant dense<0.000000e+00> : vector<64x128xf32>
    %36 = tpu.matmul %34, %35, %cst_49 {dimension_numbers = #tpu.dot_dimension_numbers<[1], [0], [0], [1], [0, 0, 1, 1], [], []>} : vector<64x128xbf16>, vector<128x128xbf16>, vector<64x128xf32> -> vector<64x128xf32>
    %37 = arith.addf %32, %36 : vector<64x128xf32>
    %c0_50 = arith.constant 0 : index
    %c1_51 = arith.constant 1 : index
    %c0_52 = arith.constant 0 : index
    %38 = vector.load %arg8[%c0_50, %c1_51, %c0_52] : memref<10x10x128xbf16, #tpu.memory_space<vmem>>, vector<8x8x128xbf16>
    %39 = vector.shape_cast %38 : vector<8x8x128xbf16> to vector<64x128xbf16>
    %c128_53 = arith.constant 128 : index
    %c0_54 = arith.constant 0 : index
    %40 = vector.load %arg4[%c128_53, %c0_54] : memref<1152x128xbf16, #tpu.memory_space<vmem>>, vector<128x128xbf16>
    %cst_55 = arith.constant dense<0.000000e+00> : vector<64x128xf32>
    %41 = tpu.matmul %39, %40, %cst_55 {dimension_numbers = #tpu.dot_dimension_numbers<[1], [0], [0], [1], [0, 0, 1, 1], [], []>} : vector<64x128xbf16>, vector<128x128xbf16>, vector<64x128xf32> -> vector<64x128xf32>
    %42 = arith.addf %37, %41 : vector<64x128xf32>
    %c0_56 = arith.constant 0 : index
    %c2 = arith.constant 2 : index
    %c0_57 = arith.constant 0 : index
    %43 = vector.load %arg8[%c0_56, %c2, %c0_57] : memref<10x10x128xbf16, #tpu.memory_space<vmem>>, vector<8x8x128xbf16>
    %44 = vector.shape_cast %43 : vector<8x8x128xbf16> to vector<64x128xbf16>
    %c256_58 = arith.constant 256 : index
    %c0_59 = arith.constant 0 : index
    %45 = vector.load %arg4[%c256_58, %c0_59] : memref<1152x128xbf16, #tpu.memory_space<vmem>>, vector<128x128xbf16>
    %cst_60 = arith.constant dense<0.000000e+00> : vector<64x128xf32>
    %46 = tpu.matmul %44, %45, %cst_60 {dimension_numbers = #tpu.dot_dimension_numbers<[1], [0], [0], [1], [0, 0, 1, 1], [], []>} : vector<64x128xbf16>, vector<128x128xbf16>, vector<64x128xf32> -> vector<64x128xf32>
    %47 = arith.addf %42, %46 : vector<64x128xf32>
    %c1_61 = arith.constant 1 : index
    %c0_62 = arith.constant 0 : index
    %c0_63 = arith.constant 0 : index
    %48 = vector.load %arg8[%c1_61, %c0_62, %c0_63] : memref<10x10x128xbf16, #tpu.memory_space<vmem>>, vector<8x8x128xbf16>
    %49 = vector.shape_cast %48 : vector<8x8x128xbf16> to vector<64x128xbf16>
    %c384_64 = arith.constant 384 : index
    %c0_65 = arith.constant 0 : index
    %50 = vector.load %arg4[%c384_64, %c0_65] : memref<1152x128xbf16, #tpu.memory_space<vmem>>, vector<128x128xbf16>
    %cst_66 = arith.constant dense<0.000000e+00> : vector<64x128xf32>
    %51 = tpu.matmul %49, %50, %cst_66 {dimension_numbers = #tpu.dot_dimension_numbers<[1], [0], [0], [1], [0, 0, 1, 1], [], []>} : vector<64x128xbf16>, vector<128x128xbf16>, vector<64x128xf32> -> vector<64x128xf32>
    %52 = arith.addf %47, %51 : vector<64x128xf32>
    %c1_67 = arith.constant 1 : index
    %c1_68 = arith.constant 1 : index
    %c0_69 = arith.constant 0 : index
    %53 = vector.load %arg8[%c1_67, %c1_68, %c0_69] : memref<10x10x128xbf16, #tpu.memory_space<vmem>>, vector<8x8x128xbf16>
    %54 = vector.shape_cast %53 : vector<8x8x128xbf16> to vector<64x128xbf16>
    %c512 = arith.constant 512 : index
    %c0_70 = arith.constant 0 : index
    %55 = vector.load %arg4[%c512, %c0_70] : memref<1152x128xbf16, #tpu.memory_space<vmem>>, vector<128x128xbf16>
    %cst_71 = arith.constant dense<0.000000e+00> : vector<64x128xf32>
    %56 = tpu.matmul %54, %55, %cst_71 {dimension_numbers = #tpu.dot_dimension_numbers<[1], [0], [0], [1], [0, 0, 1, 1], [], []>} : vector<64x128xbf16>, vector<128x128xbf16>, vector<64x128xf32> -> vector<64x128xf32>
    %57 = arith.addf %52, %56 : vector<64x128xf32>
    %c1_72 = arith.constant 1 : index
    %c2_73 = arith.constant 2 : index
    %c0_74 = arith.constant 0 : index
    %58 = vector.load %arg8[%c1_72, %c2_73, %c0_74] : memref<10x10x128xbf16, #tpu.memory_space<vmem>>, vector<8x8x128xbf16>
    %59 = vector.shape_cast %58 : vector<8x8x128xbf16> to vector<64x128xbf16>
    %c640 = arith.constant 640 : index
    %c0_75 = arith.constant 0 : index
    %60 = vector.load %arg4[%c640, %c0_75] : memref<1152x128xbf16, #tpu.memory_space<vmem>>, vector<128x128xbf16>
    %cst_76 = arith.constant dense<0.000000e+00> : vector<64x128xf32>
    %61 = tpu.matmul %59, %60, %cst_76 {dimension_numbers = #tpu.dot_dimension_numbers<[1], [0], [0], [1], [0, 0, 1, 1], [], []>} : vector<64x128xbf16>, vector<128x128xbf16>, vector<64x128xf32> -> vector<64x128xf32>
    %62 = arith.addf %57, %61 : vector<64x128xf32>
    %c2_77 = arith.constant 2 : index
    %c0_78 = arith.constant 0 : index
    %c0_79 = arith.constant 0 : index
    %63 = vector.load %arg8[%c2_77, %c0_78, %c0_79] : memref<10x10x128xbf16, #tpu.memory_space<vmem>>, vector<8x8x128xbf16>
    %64 = vector.shape_cast %63 : vector<8x8x128xbf16> to vector<64x128xbf16>
    %c768 = arith.constant 768 : index
    %c0_80 = arith.constant 0 : index
    %65 = vector.load %arg4[%c768, %c0_80] : memref<1152x128xbf16, #tpu.memory_space<vmem>>, vector<128x128xbf16>
    %cst_81 = arith.constant dense<0.000000e+00> : vector<64x128xf32>
    %66 = tpu.matmul %64, %65, %cst_81 {dimension_numbers = #tpu.dot_dimension_numbers<[1], [0], [0], [1], [0, 0, 1, 1], [], []>} : vector<64x128xbf16>, vector<128x128xbf16>, vector<64x128xf32> -> vector<64x128xf32>
    %67 = arith.addf %62, %66 : vector<64x128xf32>
    %c2_82 = arith.constant 2 : index
    %c1_83 = arith.constant 1 : index
    %c0_84 = arith.constant 0 : index
    %68 = vector.load %arg8[%c2_82, %c1_83, %c0_84] : memref<10x10x128xbf16, #tpu.memory_space<vmem>>, vector<8x8x128xbf16>
    %69 = vector.shape_cast %68 : vector<8x8x128xbf16> to vector<64x128xbf16>
    %c896 = arith.constant 896 : index
    %c0_85 = arith.constant 0 : index
    %70 = vector.load %arg4[%c896, %c0_85] : memref<1152x128xbf16, #tpu.memory_space<vmem>>, vector<128x128xbf16>
    %cst_86 = arith.constant dense<0.000000e+00> : vector<64x128xf32>
    %71 = tpu.matmul %69, %70, %cst_86 {dimension_numbers = #tpu.dot_dimension_numbers<[1], [0], [0], [1], [0, 0, 1, 1], [], []>} : vector<64x128xbf16>, vector<128x128xbf16>, vector<64x128xf32> -> vector<64x128xf32>
    %72 = arith.addf %67, %71 : vector<64x128xf32>
    %c2_87 = arith.constant 2 : index
    %c2_88 = arith.constant 2 : index
    %c0_89 = arith.constant 0 : index
    %73 = vector.load %arg8[%c2_87, %c2_88, %c0_89] : memref<10x10x128xbf16, #tpu.memory_space<vmem>>, vector<8x8x128xbf16>
    %74 = vector.shape_cast %73 : vector<8x8x128xbf16> to vector<64x128xbf16>
    %c1024 = arith.constant 1024 : index
    %c0_90 = arith.constant 0 : index
    %75 = vector.load %arg4[%c1024, %c0_90] : memref<1152x128xbf16, #tpu.memory_space<vmem>>, vector<128x128xbf16>
    %cst_91 = arith.constant dense<0.000000e+00> : vector<64x128xf32>
    %76 = tpu.matmul %74, %75, %cst_91 {dimension_numbers = #tpu.dot_dimension_numbers<[1], [0], [0], [1], [0, 0, 1, 1], [], []>} : vector<64x128xbf16>, vector<128x128xbf16>, vector<64x128xf32> -> vector<64x128xf32>
    %77 = arith.addf %72, %76 : vector<64x128xf32>
    %c0_92 = arith.constant 0 : index
    %c0_93 = arith.constant 0 : index
    %78 = vector.load %arg5[%c0_92, %c0_93] : memref<1x128xf32, #tpu.memory_space<vmem>>, vector<1x128xf32>
    %79 = vector.broadcast %78 : vector<1x128xf32> to vector<64x128xf32>
    %80 = arith.addf %77, %79 : vector<64x128xf32>
    %c0_94 = arith.constant 0 : index
    %c0_95 = arith.constant 0 : index
    %c0_96 = arith.constant 0 : index
    %c384_97 = arith.constant 384 : index
    %81 = vector.load %arg1[%c0_94, %c0_95, %c0_96, %c384_97] : memref<1x9x9x512xbf16, #tpu.memory_space<vmem>>, vector<1x8x8x128xbf16>
    %82 = vector.shape_cast %81 : vector<1x8x8x128xbf16> to vector<8x8x128xbf16>
    %83 = vector.shape_cast %82 : vector<8x8x128xbf16> to vector<64x128xbf16>
    %c0_98 = arith.constant 0 : index
    %c0_99 = arith.constant 0 : index
    %84 = vector.load %arg6[%c0_98, %c0_99] : memref<128x128xbf16, #tpu.memory_space<vmem>>, vector<128x128xbf16>
    %cst_100 = arith.constant dense<0.000000e+00> : vector<64x128xf32>
    %85 = tpu.matmul %83, %84, %cst_100 {dimension_numbers = #tpu.dot_dimension_numbers<[1], [0], [0], [1], [0, 0, 1, 1], [], []>} : vector<64x128xbf16>, vector<128x128xbf16>, vector<64x128xf32> -> vector<64x128xf32>
    %86 = arith.addf %80, %85 : vector<64x128xf32>
    %cst_101 = arith.constant 0.000000e+00 : f32
    %87 = vector.broadcast %cst_101 : f32 to vector<64x128xf32>
    %88 = arith.maximumf %86, %87 : vector<64x128xf32>
    %c0_102 = arith.constant 0 : index
    %c0_103 = arith.constant 0 : index
    %c0_104 = arith.constant 0 : index
    %89 = vector.load %arg7[%c0_102, %c0_103, %c0_104] : memref<1x64x128xf32, #tpu.memory_space<vmem>>, vector<1x64x128xf32>
    %90 = vector.shape_cast %89 : vector<1x64x128xf32> to vector<64x128xf32>
    %91 = vector.shape_cast %88 : vector<64x128xf32> to vector<1x64x128xf32>
    tpu.vector_store %arg7[%c0_102, %c0_103, %c0_104], %91 {strides = array<i32>} : memref<1x64x128xf32, #tpu.memory_space<vmem>>, vector<1x64x128xf32>,
    return
  }
  func.func @transform_0(%arg0: i32) -> (i32, i32, i32, i32) {
    %c0_i32 = arith.constant 0 : i32
    %c0_i32_0 = arith.constant 0 : i32
    %c0_i32_1 = arith.constant 0 : i32
    %c0_i32_2 = arith.constant 0 : i32
    return %arg0, %c0_i32, %c0_i32_0, %c0_i32_1 : i32, i32, i32, i32
  }
  func.func @transform_1(%arg0: i32) -> (i32, i32) {
    %c0_i32 = arith.constant 0 : i32
    %c0_i32_0 = arith.constant 0 : i32
    %c0_i32_1 = arith.constant 0 : i32
    return %c0_i32, %c0_i32_0 : i32, i32
  }
  func.func @transform_2(%arg0: i32) -> (i32, i32) {
    %c0_i32 = arith.constant 0 : i32
    %c0_i32_0 = arith.constant 0 : i32
    %c0_i32_1 = arith.constant 0 : i32
    return %c0_i32, %c0_i32_0 : i32, i32
  }
  func.func @transform_3(%arg0: i32) -> (i32, i32) {
    %c0_i32 = arith.constant 0 : i32
    %c0_i32_0 = arith.constant 0 : i32
    %c0_i32_1 = arith.constant 0 : i32
    return %c0_i32, %c0_i32_0 : i32, i32
  }
  func.func @transform_4(%arg0: i32) -> (i32, i32) {
    %c0_i32 = arith.constant 0 : i32
    %c0_i32_0 = arith.constant 0 : i32
    %c0_i32_1 = arith.constant 0 : i32
    return %c0_i32, %c0_i32_0 : i32, i32
  }
  func.func @transform_5(%arg0: i32) -> (i32, i32) {
    %c0_i32 = arith.constant 0 : i32
    %c0_i32_0 = arith.constant 0 : i32
    %c0_i32_1 = arith.constant 0 : i32
    return %c0_i32, %c0_i32_0 : i32, i32
  }
  func.func @transform_6(%arg0: i32) -> (i32, i32, i32) {
    %c0_i32 = arith.constant 0 : i32
    %c0_i32_0 = arith.constant 0 : i32
    %c0_i32_1 = arith.constant 0 : i32
    return %arg0, %c0_i32, %c0_i32_0 : i32, i32, i32
  }
}

</mosaic_0001>

<bundles_post_ra>
// kernel: tpu_custom_call.1
= control target key start
LH: loop header
LB: loop body
LE: loop exit
PB: predicated region body
PF: predicated region fallthrough
CT: control target
= control target key end

     0   :  { %11 = vsyncpa [#allocation4], 0  ;;  %s6409_s0 = inlined_call_operand.vmem [shape: bf16[2,9,9,512], index: 0, kind: input, shape index: {}]   ;;  %s6410_s1 = inlined_call_operand.vmem [shape: bf16[1152,128], index: 1, kind: input, shape index: {}]   ;;  %s6411_s2 = inlined_call_operand.vmem [shape: f32[1,128], index: 2, kind: input, shape index: {}]   ;;  %s6412_s3 = inlined_call_operand.hbm [shape: bf16[1152,128], index: 3, kind: input, shape index: {}]   ;;  %s6413_s4 = inlined_call_operand.vmem [shape: f32[1,128], index: 4, kind: input, shape index: {}]   ;;  %s6414_s5 = inlined_call_operand.vmem [shape: bf16[128,128], index: 5, kind: input, shape index: {}]   ;;  %s6415_s6 = inlined_call_operand.hbm [shape: f32[2,64,128], index: 6, kind: output, shape index: {}]  }
   0x1   :  { %12 = vsyncpa [#allocation5], 0 }
   0x2   :  { %14 = vsyncpa [#allocation5 + $0x1], 0  ;;  %s5404_s21 = smov 0   ;;  %s5406_s22 = smov 0  }
   0x3   :  { %s5408_s23 = smov 0   ;;  %s5410_s24 = smov 0  }
   0x4 LB: > { %s5425_s25 = sadd.s32 4294967295, %s5360_s24   ;;  %s4122_s26 = sadd.s32 4294967294, %s5360_s24   ;;  %s5360_s24 = sphi %s5410_s24, %s6456_s24   ;;  %s5356_s23 = sphi %s5408_s23, %s6455_s23   ;;  %s5352_s22 = sphi %s5406_s22, %s6454_s22   ;;  %s5348_s21 = sphi %s5404_s21, %s6453_s21  }
   0x5   : > { %s5429_s27 = sadd.s32 1, %s5360_s24   ;;  %s158_s28 = sadd.s32 1, %s5356_s23 }
   0x6   : > { %s155_s29 = ssub.s32 %s5360_s24, %s5429_s27  ;;  %p168_p0 = scmp.ne.s32.totalorder %s5356_s23, %s5352_s22 }
   0x7   : > { %p156_p1 = scmp.eq.s32.totalorder %s155_s29, 0  ;;  %p169_p2 = scmp.eq.s32.totalorder %s5425_s25, 1 }
   0x8   : > { %p174_p3 = scmp.ne.s32.totalorder %s5352_s22, %s5348_s21  ;;  %p175_p4 = scmp.eq.s32.totalorder %s4122_s26, 1 }
   0x9   : > { %s5440_s30 = scalar_select %p156_p1, %s5356_s23, %s158_s28  }
   0xa   : > { %p5442_p5 = por %p169_p2, %p168_p0  ;;  %p5446_p6 = por %p175_p4, %p174_p3 }
   0xb   : > { %p4123_p7 = scmp.ge.s32.totalorder %s5360_s24, 1  ;;  %p182_p8 = scmp.lt.s32.totalorder %s5360_s24, 3 }
   0xc   : > { %s6420_s8 = scalar_select %p5446_p6, 1, 0 }
   0xd   : > { %p5041_p9 = scmp.eq.s32.totalorder %s5425_s25, 0  ;;  %p5453_p10 = pnand %p4123_p7, %p182_p8 }
   0xe   : > { %s5362_s10 = smov [#allocation3]  }
   0xf   : > { %s200_s11 = sshll.u32 %s5362_s10, 4  ;;  %p5033_p11 = pneg %p5453_p10  ;;  %s201_s11 = int_to_ptr.vmem [resolvable:$true] %s200_s11 }
  0x10   : > { %s5281_s12 = scalar_lea.vmem %s201_s11, 9216  ;;  %p5289_p3 = scmp.lt.s32.totalorder %s201_s11, %s201_s11 }
  0x11   : > { %p5034_p12 = pnand %p5041_p9, %p5033_p11  ;;  %p5282_p0 = scmp.ne.s32.totalorder %s201_s11, %s5281_s12 }
  0x12   : > { %p5290_p4 = scmp.lt.s32.totalorder %s5281_s12, %s5281_s12 }
  0x13   : > { %p5272_p13 = pneg %p5034_p12 }
  0x14   : > { %p5291_p6 = por %p5290_p4, %p5289_p3 }
  0x15   : > { %p5284_p1 = pnand %p5282_p0, %p5272_p13 }
  0x17   : > { %p5285_p2 = pneg %p5284_p1 }
  0x19   : > { %p5292_p7 = pnand %p5291_p6, %p5285_p2 }
  0x1b   : > { %5295 = shalt.err (!%p5292_p7)
}
  0x1c   : > { %s5363_s13 = smov 64   ;;  %s5364_s14 = smov 4  }
  0x1d   : > { %5036 = dma.hbm_to_vmem [thread:$0]  (!%p5034_p12), %s6412_s3, 9216, %s201_s11, [#allocation4], %s5363_s13, %s5363_s13, %s5364_s14  }
  0x1e   : > { %230 = sbr.rel (%p5453_p10) target bundleno = 747 (0x2eb), region = 44 }
  0x23   : > { %5339 = dma.done.wait (%p5041_p9), [#allocation4], 9216  }
  0x24   : > { %5341 = vsyncadd (%p5041_p9), [#allocation4], 4294958080  ;;  %v5082_v0 = vld [vmem:[%s6410_s1 + $0x78] sm:$0xff]   ;;  %v5086_v4 = vld [vmem:[%s6410_s1 + $0x70] sm:$0xff]   ;;  %p260_p6 = scmp.lt.s32.totalorder %s5425_s25, 1  ;;  %vm1820_vm0 = vcmask 1043456  }
  0x25   : > { %v5083_v1 = vld [vmem:[%s6410_s1 + $0x38] sm:$0xff]   ;;  %4454 = vmatprep.subr.bf16.mxu0 %v5082_v0  ;;  %v5087_v5 = vld [vmem:[%s6410_s1 + $0x30] sm:$0xff]   ;;  %v5090_v8 = vld [vmem:[%s6410_s1 + $0x68] sm:$0xff]   ;;  %vm1821_vm1 = vsmask.f32 7938  ;;  %vm1826_vm2 = vcmask 1040384  }
  0x26   : > { %v5084_v2 = vld [vmem:[%s6410_s1 + $0xf8] sm:$0xff]   ;;  %4455 = vmatpush3.bf16.msra.mxu0 %v5083_v1  ;;  %v5088_v6 = vld [vmem:[%s6410_s1 + $0xf0] sm:$0xff]   ;;  %v5091_v9 = vld [vmem:[%s6410_s1 + $0x28] sm:$0xff]   ;;  %s261_s16 = scalar_select %p260_p6, %s5425_s25, 1  ;;  %vm1827_vm3 = vsmask.f32 256 }
  0x27   : > { %v5085_v3 = vld [vmem:[%s6410_s1 + $0xb8] sm:$0xff]   ;;  %4494 = vmatprep.subr.bf16.mxu1 %v5084_v2  ;;  %4456 = vmatprep.subr.bf16.mxu0 %v5086_v4  ;;  %v5089_v7 = vld [vmem:[%s6410_s1 + $0xb0] sm:$0xff]   ;;  %v5092_v10 = vld [vmem:[%s6410_s1 + $0xe8] sm:$0xff]   ;;  %vm1906_vm4 = vsmask.f32 3328  ;;  %vm2327_vm9 = vcmask 1042432  }
  0x28   : > { %4495 = vmatpush3.bf16.msra.mxu1 %v5085_v3  ;;  %v5093_v11 = vld [vmem:[%s6410_s1 + $0xa8] sm:$0xff]   ;;  %v5094_v12 = vld [vmem:[%s6410_s1 + $0x60] sm:$0xff]   ;;  %v5098_v16 = vld [vmem:[%s6410_s1 + $0x58] sm:$0xff]   ;;  %s5026_s10 = smul.u32 288, %s261_s16  ;;  %vm1907_vm5 = vsmask.f32 7440 }
  0x29   : > { %4496 = vmatprep.subr.bf16.mxu1 %v5088_v6  ;;  %v5095_v13 = vld [vmem:[%s6410_s1 + $0x20] sm:$0xff]   ;;  %v5099_v17 = vld [vmem:[%s6410_s1 + $0x18] sm:$0xff]   ;;  %v5102_v20 = vld [vmem:[%s6410_s1 + $0x50] sm:$0xff]   ;;  %vm2328_vm10 = vcmask 1046532   ;;  %s4453_s17 = sshll.u32 %s5425_s25, 10  ;;  %s5366_s28 = smov [#allocation6]  }
  0x2a   : > { %4457 = vmatpush3.bf16.msra.mxu0 %v5087_v5  ;;  %v5096_v14 = vld [vmem:[%s6410_s1 + $0xe0] sm:$0xff]   ;;  %v5100_v18 = vld [vmem:[%s6410_s1 + $0xd8] sm:$0xff]   ;;  %v5103_v21 = vld [vmem:[%s6410_s1 + $0x10] sm:$0xff]   ;;  %s5565_s26 = scalar_lea.vmem %s6409_s0, %s5026_s10  ;;  %s6364_s16 = scalar_lea.hbm %s6415_s6, %s4453_s17 }
  0x2b   : > { %4458 = vmatprep.subr.bf16.mxu0 %v5090_v8  ;;  %v5097_v15 = vld [vmem:[%s6410_s1 + $0xa0] sm:$0xff]   ;;  %v5101_v19 = vld [vmem:[%s6410_s1 + $0x98] sm:$0xff]   ;;  %v5104_v22 = vld [vmem:[%s6410_s1 + $0xd0] sm:$0xff]   ;;  %s5300_s29 = sshll.u32 %s5366_s28, 4  ;;  %s5301_s29 = int_to_ptr.vmem [resolvable:$false] %s5300_s29 }
  0x2c   : > { %4497 = vmatpush3.bf16.msra.mxu1 %v5089_v7  ;;  %v5105_v23 = vld [vmem:[%s6410_s1 + $0x90] sm:$0xff]   ;;  %v5106_v24 = vld [vmem:[%s6410_s1 + $0x48] sm:$0xff]   ;;  %v5110_v28 = vld [vmem:[%s6410_s1 + $0x40] sm:$0xff]   ;;  %s5302_s9 = scalar_lea.vmem %s5301_s29, 2048 }
  0x2d   : > { %4498 = vmatprep.subr.bf16.mxu1 %v5092_v10  ;;  %v5107_v25 = vld [vmem:[%s6410_s1 + $0x8] sm:$0xff]   ;;  %v5111_v29 = vld [vmem:[%s6410_s1] sm:$0xff]   ;;  %v282_v37 = vld [vmem:[%s5565_s26 + $0x10] sm:$0x1] }
  0x2e   : > { %4459 = vmatpush3.bf16.msra.mxu0 %v5091_v9  ;;  %v5108_v26 = vld [vmem:[%s6410_s1 + $0xc8] sm:$0xff]   ;;  %v5112_v30 = vld [vmem:[%s6410_s1 + $0xc0] sm:$0xff]   ;;  %v283_v38 = vld [vmem:[%s5565_s26 + $0x30] sm:$0x1] }
  0x2f   : > { %4460 = vmatprep.subr.bf16.mxu0 %v5094_v12  ;;  %v5109_v27 = vld [vmem:[%s6410_s1 + $0x88] sm:$0xff]   ;;  %v274_v31 = vld [vmem:[%s5565_s26 + $0x4] sm:$0xf]  ;;  %v266_v35 = vld [vmem:[%s5565_s26] sm:$0xf] }
  0x30   : > { %4499 = vmatpush3.bf16.msra.mxu1 %v5093_v11  ;;  %v275_v32 = vld [vmem:[%s5565_s26 + $0x24] sm:$0xf]  ;;  %v267_v36 = vld [vmem:[%s5565_s26 + $0x20] sm:$0xf]  ;;  %v4154_v39 = vcombine.low %v266_v35, %v282_v37  ;;  %v5116_v42 = vld [vmem:[%s6410_s1 + $0x178] sm:$0xff]  }
  0x31   : > { %4500 = vmatprep.subr.bf16.mxu1 %v5096_v14  ;;  %v4180_v33 = vcombine.low %v274_v31, %v275_v32  ;;  %v5113_v34 = vld [vmem:[%s6410_s1 + $0x80] sm:$0xff]   ;;  %v4155_v40 = vcombine.low %v267_v36, %v283_v38  ;;  %v4179_v41 = vcombine.low %v266_v35, %v267_v36  ;;  %v290_v43 = vld [vmem:[%s5565_s26 + $0x8] sm:$0xf]  ;;  %v5119_v48 = vld [vmem:[%s6410_s1 + $0x138] sm:$0xff]  }
  0x32   : > { %4461 = vmatpush3.bf16.msra.mxu0 %v5095_v13  ;;  %v291_v44 = vld [vmem:[%s5565_s26 + $0x28] sm:$0xf]  ;;  %v382_v45 = vshll.u32 %v4154_v39, 16  ;;  %v380_v49 = vshrl.u32 %v4154_v39, 16  ;;  %v5120_v51 = vld [vmem:[%s6410_s1 + $0x1f8] sm:$0xff]   ;;  %v5122_v57 = vld [vmem:[%s6410_s1 + $0x170] sm:$0xff]  }
  0x33   : > { %4462 = vmatprep.subr.bf16.mxu0 %v5098_v16  ;;  %1386 = vmatprep.mubr.bf16.mxu0 %v4180_v33  ;;  %v389_v46 = vshll.u32 %v4155_v40, 16  ;;  %v4182_v47 = vcombine.low %v290_v43, %v291_v44  ;;  %v387_v50 = vshrl.u32 %v4155_v40, 16  ;;  %v5121_v56 = vld [vmem:[%s6410_s1 + $0x1b8] sm:$0xff]   ;;  %v5123_v59 = vld [vmem:[%s6410_s1 + $0x130] sm:$0xff]   ;;  %v276_v61 = vld [vmem:[%s5565_s26 + $0x44] sm:$0xf] }
  0x34   : > { %4501 = vmatpush3.bf16.msra.mxu1 %v5097_v15  ;;  %v384_v52 = vrot.slane %v382_v45, 1  ;;  %v5124_v60 = vld [vmem:[%s6410_s1 + $0x1f0] sm:$0xff]   ;;  %v277_v62 = vld [vmem:[%s5565_s26 + $0x64] sm:$0xf]  ;;  %v268_v1 = vld [vmem:[%s5565_s26 + $0x40] sm:$0xf] }
  0x35   : > { %4502 = vmatprep.subr.bf16.mxu1 %v5100_v18  ;;  %1451 = vmatprep.mubr.bf16.mxu1 %v4182_v47  ;;  %v391_v53 = vrot.slane %v389_v46, 1  ;;  %v4189_v63 = vcombine.low %v276_v61, %v277_v62  ;;  %v5125_v0 = vld [vmem:[%s6410_s1 + $0x1b0] sm:$0xff]   ;;  %v269_v2 = vld [vmem:[%s5565_s26 + $0x60] sm:$0xf]  ;;  %v5128_v8 = vld [vmem:[%s6410_s1 + $0x168] sm:$0xff]  }
  0x36   : > { %4463 = vmatpush3.bf16.msra.mxu0 %v5099_v17  ;;  %v385_v54 = vor.u32 %v384_v52, %v380_v49  ;;  %v284_v3 = vld [vmem:[%s5565_s26 + $0x50] sm:$0x1]  ;;  %v4188_v5 = vcombine.low %v268_v1, %v269_v2  ;;  %v292_v9 = vld [vmem:[%s5565_s26 + $0x48] sm:$0xf]  ;;  %v306_v10 = vld [vmem:[%s5565_s26 + $0x18] sm:$0x1] }
  0x37   : > { %4464 = vmatprep.subr.bf16.mxu0 %v5102_v20  ;;  %v392_v55 = vor.u32 %v391_v53, %v387_v50  ;;  %v285_v4 = vld [vmem:[%s5565_s26 + $0x70] sm:$0x1]  ;;  %v4156_v6 = vcombine.low %v268_v1, %v284_v3  ;;  %v307_v11 = vld [vmem:[%s5565_s26 + $0x38] sm:$0x1]  ;;  %v293_v12 = vld [vmem:[%s5565_s26 + $0x68] sm:$0xf]  ;;  %v5624_v20 = vcombine.low %v290_v43, %v306_v10 }
  0x38   : > { %4503 = vmatpush3.bf16.msra.mxu1 %v5101_v19  ;;  %v4157_v7 = vcombine.low %v269_v2, %v285_v4  ;;  %v4191_v15 = vcombine.low %v292_v9, %v293_v12  ;;  %v5131_v16 = vld [vmem:[%s6410_s1 + $0x128] sm:$0xff]   ;;  %v5136_v32 = vld [vmem:[%s6410_s1 + $0x1e0] sm:$0xff]   ;;  %v309_v36 = vld [vmem:[%s5565_s26 + $0x78] sm:$0x1] }
  0x39   : > { %4504 = vmatprep.subr.bf16.mxu1 %v5104_v22  ;;  %v4181_v58 = vcombine.low %v385_v54, %v392_v55  ;;  %v396_v13 = vshll.u32 %v4156_v6, 16  ;;  %v394_v17 = vshrl.u32 %v4156_v6, 16  ;;  %v5132_v19 = vld [vmem:[%s6410_s1 + $0x1e8] sm:$0xff]   ;;  %v278_v33 = vld [vmem:[%s5565_s26 + $0x84] sm:$0xf]  ;;  %v476_v43 = vshrl.u32 %v5624_v20, 16  ;;  %vm5901_vm6 = vmand %vm1820_vm0, %vm1821_vm1 }
  0x3a   : > { %4465 = vmatpush3.bf16.msra.mxu0 %v5103_v21  ;;  %v403_v14 = vshll.u32 %v4157_v7, 16  ;;  %v401_v18 = vshrl.u32 %v4157_v7, 16  ;;  %v5137_v38 = vld [vmem:[%s6410_s1 + $0x1a0] sm:$0xff]   ;;  %v5140_v47 = vld [vmem:[%s6410_s1 + $0x158] sm:$0xff]   ;;  %v295_v52 = vld [vmem:[%s5565_s26 + $0xa8] sm:$0xf] }
  0x3b   : > { %4466 = vmatprep.subr.bf16.mxu0 %v5106_v24  ;;  %v398_v21 = vrot.slane %v396_v13, 1  ;;  %v5629_v24 = vcombine.low %v291_v44, %v307_v11  ;;  %v270_v39 = vld [vmem:[%s5565_s26 + $0x80] sm:$0xf]  ;;  %v5144_v61 = vld [vmem:[%s6410_s1 + $0x1d8] sm:$0xff]   ;;  %v5146_v3 = vld [vmem:[%s6410_s1 + $0x150] sm:$0xff]  }
  0x3c   : > { %4505 = vmatpush3.bf16.msra.mxu1 %v5105_v23  ;;  %v405_v22 = vrot.slane %v403_v14, 1  ;;  %v5133_v23 = vld [vmem:[%s6410_s1 + $0x1a8] sm:$0xff]   ;;  %v271_v40 = vld [vmem:[%s5565_s26 + $0xa0] sm:$0xf]  ;;  %v310_v62 = vld [vmem:[%s5565_s26 + $0x98] sm:$0x1] }
  0x3d   : > { %4506 = vmatprep.subr.bf16.mxu1 %v5108_v26  ;;  %v485_v35 = vshll.u32 %v5629_v24, 16  ;;  %v4197_v46 = vcombine.low %v270_v39, %v271_v40  ;;  %v483_v49 = vshrl.u32 %v5629_v24, 16  ;;  %v5145_v1 = vld [vmem:[%s6410_s1 + $0x198] sm:$0xff]   ;;  %v289_v24 = vld [vmem:[%s5565_s26 + $0xf0] sm:$0x1]  ;;  %vm5907_vm7 = vmand %vm1826_vm2, %vm1827_vm3 }
  0x3e   : > { %4467 = vmatpush3.bf16.msra.mxu0 %v5107_v25  ;;  %v399_v25 = vor.u32 %v398_v21, %v394_v17  ;;  %v406_v26 = vor.u32 %v405_v22, %v401_v18  ;;  %v311_v4 = vld [vmem:[%s5565_s26 + $0xb8] sm:$0x1]  ;;  %v5149_v18 = vld [vmem:[%s6410_s1 + $0x190] sm:$0xff]   ;;  %v273_v22 = vld [vmem:[%s5565_s26 + $0xe0] sm:$0xf] }
  0x3f   : > { %4468 = vmatprep.subr.bf16.mxu0 %v5110_v28  ;;  %v5135_v28 = vld [vmem:[%s6410_s1 + $0x120] sm:$0xff]   ;;  %v487_v53 = vrot.slane %v485_v35, 1  ;;  %v5695_v21 = vcombine.low %v295_v52, %v311_v4  ;;  %v5162_v4 = vld [vmem:[%s6410_s1 + $0x238] sm:$0xff]   ;;  %vm5921_vm8 = vmor %vm1906_vm4, %vm1907_vm5 }
  0x40   : > { %4507 = vmatpush3.bf16.msra.mxu1 %v5109_v27  ;;  %v5134_v27 = vld [vmem:[%s6410_s1 + $0x160] sm:$0xff]   ;;  %v4190_v31 = vcombine.low %v399_v25, %v406_v26  ;;  %vm5999_vm11 = vmor %vm2327_vm9, %vm2328_vm10 }
  0x41   : > { %4508 = vmatprep.subr.bf16.mxu1 %v5112_v30  ;;  %v308_v30 = vld [vmem:[%s5565_s26 + $0x58] sm:$0x1]  ;;  %v488_v10 = vor.u32 %v487_v53, %v483_v49 }
  0x42   : > { %4469 = vmatpush3.bf16.msra.mxu0 %v5111_v29  ;;  %v478_v29 = vshll.u32 %v5624_v20, 16  ;;  %v5658_v50 = vcombine.low %v292_v9, %v308_v30 }
  0x43   : > { %4534 = vmatprep.subr.bf16.mxu0 %v5116_v42  ;;  %v287_v42 = vld [vmem:[%s5565_s26 + $0xb0] sm:$0x1] }
  0x44   : > { %4509 = vmatpush3.bf16.msra.mxu1 %v5113_v34  ;;  %v279_v34 = vld [vmem:[%s5565_s26 + $0xa4] sm:$0xf]  ;;  %v4159_v45 = vcombine.low %v271_v40, %v287_v42  ;;  %v492_v2 = vshll.u32 %v5658_v50, 16  ;;  %v490_v13 = vshrl.u32 %v5658_v50, 16  ;;  %v5156_v42 = vld [vmem:[%s6410_s1 + $0x1c8] sm:$0xff]  }
  0x45   : > { %1387 = vmatmul.mubr.bf16.vlgmr.msra.gmra.mxu0 %v4179_v41  ;;  %4574 = vmatprep.subr.bf16.mxu1 %v5120_v51  ;;  %v4198_v37 = vcombine.low %v278_v33, %v279_v34  ;;  %v286_v41 = vld [vmem:[%s5565_s26 + $0x90] sm:$0x1]  ;;  %v294_v51 = vld [vmem:[%s5565_s26 + $0x88] sm:$0xf] }
  0x46   : > { %4535 = vmatpush3.bf16.msra.mxu0 %v5119_v48  ;;  %1394 = vmatprep.mubr.bf16.mxu0 %v4189_v63  ;;  %v4158_v44 = vcombine.low %v270_v39, %v286_v41  ;;  %v480_v48 = vrot.slane %v478_v29, 1  ;;  %v417_v55 = vshll.u32 %v4159_v45, 16  ;;  %v5687_v14 = vcombine.low %v294_v51, %v310_v62  ;;  %v5152_v29 = vld [vmem:[%s6410_s1 + $0x148] sm:$0xff]  }
  0x47   : > { %4536 = vmatprep.subr.bf16.mxu0 %v5122_v57  ;;  %1452 = vmatmul.mubr.bf16.vlgmr.msra.gmra.mxu1 %v4181_v58  ;;  %v5662_v57 = vcombine.low %v293_v12, %v309_v36  ;;  %v5143_v58 = vld [vmem:[%s6410_s1 + $0x118] sm:$0xff]   ;;  %v5148_v12 = vld [vmem:[%s6410_s1 + $0x1d0] sm:$0xff]   ;;  %v494_v20 = vrot.slane %v492_v2, 1  ;;  %v297_v33 = vld [vmem:[%s5565_s26 + $0xe8] sm:$0xf] }
  0x48   : > { %4575 = vmatpush3.bf16.msra.mxu1 %v5121_v56  ;;  %1459 = vmatprep.mubr.bf16.mxu1 %v4191_v15  ;;  %v410_v54 = vshll.u32 %v4158_v44, 16  ;;  %v4200_v56 = vcombine.low %v294_v51, %v295_v52  ;;  %v481_v9 = vor.u32 %v480_v48, %v476_v43  ;;  %v280_v15 = vld [vmem:[%s5565_s26 + $0xc4] sm:$0xf]  ;;  %v5155_v39 = vld [vmem:[%s6410_s1 + $0x108] sm:$0xff]   ;;  %v513_v43 = vshll.u32 %v5695_v21, 16 }
  0x49   : > { %4576 = vmatprep.subr.bf16.mxu1 %v5124_v60  ;;  %v415_v60 = vshrl.u32 %v4159_v45, 16  ;;  %v499_v7 = vshll.u32 %v5662_v57, 16  ;;  %v497_v30 = vshrl.u32 %v5662_v57, 16  ;;  %v5158_v48 = vld [vmem:[%s6410_s1 + $0x140] sm:$0xff]   ;;  %v504_v49 = vshrl.u32 %v5687_v14, 16 }
  0x4a   : > { %4537 = vmatpush3.bf16.msra.mxu0 %v5123_v59  ;;  %v408_v59 = vshrl.u32 %v4158_v44, 16  ;;  %v412_v63 = vrot.slane %v410_v54, 1  ;;  %v4184_v25 = vcombine.low %v481_v9, %v488_v10  ;;  %v313_v44 = vld [vmem:[%s5565_s26 + $0xf8] sm:$0x1]  ;;  %v495_v52 = vor.u32 %v494_v20, %v490_v13  ;;  %v300_v13 = vld [vmem:[%s5565_s26 + $0x4c] sm:$0xf] }
  0x4b   : > { %4538 = vmatprep.subr.bf16.mxu0 %v5128_v8  ;;  %v5147_v8 = vld [vmem:[%s6410_s1 + $0x110] sm:$0xff]   ;;  %v501_v34 = vrot.slane %v499_v7, 1  ;;  %v515_v62 = vrot.slane %v513_v43, 1  ;;  %v5746_v7 = vld [vmem:[%s5565_s26 + $0x20] sm:$0xf] }
  0x4c   : > { %4577 = vmatpush3.bf16.msra.mxu1 %v5125_v0  ;;  %v419_v0 = vrot.slane %v417_v55, 1  ;;  %v5159_v55 = vld [vmem:[%s6410_s1 + $0x100] sm:$0xff]  }
  0x4d   : > { %1395 = vmatmul.mubr.bf16.gmra.mxu0 %v4188_v5  ;;  %4578 = vmatprep.subr.bf16.mxu1 %v5132_v19  ;;  %v413_v5 = vor.u32 %v412_v63, %v408_v59  ;;  %v272_v19 = vld [vmem:[%s5565_s26 + $0xc0] sm:$0xf]  ;;  %v502_v53 = vor.u32 %v501_v34, %v497_v30  ;;  %v511_v59 = vshrl.u32 %v5695_v21, 16  ;;  %v298_v63 = vld [vmem:[%s5565_s26 + $0xc] sm:$0xf] }
  0x4e   : > { %4539 = vmatpush3.bf16.msra.mxu0 %v5131_v16  ;;  %1402 = vmatprep.mubr.bf16.mxu0 %v4198_v37  ;;  %v420_v6 = vor.u32 %v419_v0, %v415_v60  ;;  %v281_v16 = vld [vmem:[%s5565_s26 + $0xe4] sm:$0xf]  ;;  %v312_v37 = vld [vmem:[%s5565_s26 + $0xd8] sm:$0x1]  ;;  %v5732_v60 = vcombine.low %v297_v33, %v313_v44  ;;  %v299_v0 = vld [vmem:[%s5565_s26 + $0x2c] sm:$0xf] }
  0x4f   : > { %4540 = vmatprep.subr.bf16.mxu0 %v5134_v27  ;;  %1460 = vmatmul.mubr.bf16.gmra.mxu1 %v4190_v31  ;;  %v4207_v17 = vcombine.low %v280_v15, %v281_v16  ;;  %v4161_v27 = vcombine.low %v273_v22, %v289_v24  ;;  %v506_v31 = vshll.u32 %v5687_v14, 16  ;;  %v301_v14 = vld [vmem:[%s5565_s26 + $0x6c] sm:$0xf]  ;;  %v516_v16 = vor.u32 %v515_v62, %v511_v59  ;;  %v4132_v20 = vld [vmem:[%s5565_s26 + $0x60] sm:$0xf] }
  0x50   : > { %4579 = vmatpush3.bf16.msra.mxu1 %v5133_v23  ;;  %1467 = vmatprep.mubr.bf16.mxu1 %v4200_v56  ;;  %v4199_v11 = vcombine.low %v413_v5, %v420_v6  ;;  %v288_v23 = vld [vmem:[%s5565_s26 + $0xd0] sm:$0x1]  ;;  %v4138_v5 = vld [vmem:[%s5565_s26 + $0x24] sm:$0xf]  ;;  %v527_v9 = vshll.u32 %v5732_v60, 16  ;;  %v525_v30 = vshrl.u32 %v5732_v60, 16 }
  0x51   : > { %4580 = vmatprep.subr.bf16.mxu1 %v5136_v32  ;;  %v4160_v26 = vcombine.low %v272_v19, %v288_v23  ;;  %v296_v32 = vld [vmem:[%s5565_s26 + $0xc8] sm:$0xf]  ;;  %v431_v36 = vshll.u32 %v4161_v27, 16  ;;  %v429_v41 = vshrl.u32 %v4161_v27, 16  ;;  %v508_v56 = vrot.slane %v506_v31, 1 }
  0x52   : > { %4541 = vmatpush3.bf16.msra.mxu0 %v5135_v28  ;;  %v4206_v28 = vcombine.low %v272_v19, %v273_v22  ;;  %v5723_v54 = vcombine.low %v296_v32, %v312_v37  ;;  %v4139_v6 = vld [vmem:[%s5565_s26 + $0x44] sm:$0xf]  ;;  %v4192_v23 = vcombine.low %v300_v13, %v301_v14  ;;  %v4133_v27 = vld [vmem:[%s5565_s26 + $0x80] sm:$0xf]  ;;  %v529_v31 = vrot.slane %v527_v9, 1  ;;  %v5172_v13 = vld [vmem:[%s6410_s1 + $0x208] sm:$0xff]  }
  0x53   : > { %4542 = vmatprep.subr.bf16.mxu0 %v5140_v47  ;;  %v424_v35 = vshll.u32 %v4160_v26, 16  ;;  %v422_v40 = vshrl.u32 %v4160_v26, 16  ;;  %v5157_v47 = vld [vmem:[%s6410_s1 + $0x188] sm:$0xff]   ;;  %v4186_v10 = vcombine.low %v4138_v5, %v4139_v6  ;;  %v509_v15 = vor.u32 %v508_v56, %v504_v49  ;;  %v4141_v19 = vld [vmem:[%s5565_s26 + $0x84] sm:$0xf]  ;;  %v5171_v56 = vld [vmem:[%s6410_s1 + $0x210] sm:$0xff]  }
  0x54   : > { %4581 = vmatpush3.bf16.msra.mxu1 %v5137_v38  ;;  %v4209_v38 = vcombine.low %v296_v32, %v297_v33  ;;  %v520_v2 = vshll.u32 %v5723_v54, 16  ;;  %v518_v21 = vshrl.u32 %v5723_v54, 16  ;;  %v4149_v26 = vld [vmem:[%s5565_s26 + $0x90] sm:$0x1]  ;;  %v5167_v33 = vld [vmem:[%s6410_s1 + $0x220] sm:$0xff]  }
  0x55   : > { %1403 = vmatmul.mubr.bf16.gmra.mxu0 %v4197_v46  ;;  %4582 = vmatprep.subr.bf16.mxu1 %v5144_v61  ;;  %v426_v45 = vrot.slane %v424_v35, 1  ;;  %v433_v46 = vrot.slane %v431_v36, 1  ;;  %v5161_v61 = vld [vmem:[%s6410_s1 + $0x180] sm:$0xff]   ;;  %v5772_v32 = vcombine.low %v4133_v27, %v4149_v26  ;;  %v302_v36 = vld [vmem:[%s5565_s26 + $0x8c] sm:$0xf] }
  0x56   : > { %4543 = vmatpush3.bf16.msra.mxu0 %v5143_v58  ;;  %1410 = vmatprep.mubr.bf16.mxu0 %v4207_v17  ;;  %v5160_v58 = vld [vmem:[%s6410_s1 + $0x1c0] sm:$0xff]   ;;  %v5164_v17 = vld [vmem:[%s6410_s1 + $0x228] sm:$0xff]   ;;  %v522_v22 = vrot.slane %v520_v2, 1  ;;  %v4151_v49 = vld [vmem:[%s5565_s26 + $0xd0] sm:$0x1] }
  0x57   : > { %4544 = vmatprep.subr.bf16.mxu0 %v5146_v3  ;;  %1468 = vmatmul.mubr.bf16.gmra.mxu1 %v4199_v11  ;;  %v427_v50 = vor.u32 %v426_v45, %v422_v40  ;;  %v434_v51 = vor.u32 %v433_v46, %v429_v41  ;;  %v4183_v3 = vcombine.low %v298_v63, %v299_v0  ;;  %v5163_v11 = vld [vmem:[%s6410_s1 + $0x230] sm:$0xff]   ;;  %v303_v37 = vld [vmem:[%s5565_s26 + $0xac] sm:$0xf]  ;;  %v4142_v40 = vld [vmem:[%s5565_s26 + $0xa4] sm:$0xf] }
  0x58   : > { %4583 = vmatpush3.bf16.msra.mxu1 %v5145_v1  ;;  %1475 = vmatprep.mubr.bf16.mxu1 %v4209_v38  ;;  %v4193_v1 = vcombine.low %v495_v52, %v502_v53  ;;  %v593_v38 = vshrl.u32 %v5772_v32, 16  ;;  %v4143_v41 = vld [vmem:[%s5565_s26 + $0xc4] sm:$0xf]  ;;  %v4134_v43 = vld [vmem:[%s5565_s26 + $0xa0] sm:$0xf]  ;;  %v523_v46 = vor.u32 %v522_v22, %v518_v21  ;;  %v595_v52 = vshll.u32 %v5772_v32, 16 }
  0x59   : > { %4584 = vmatprep.subr.bf16.mxu1 %v5148_v12  ;;  %v4208_v57 = vcombine.low %v427_v50, %v434_v51  ;;  %v4135_v44 = vld [vmem:[%s5565_s26 + $0xc0] sm:$0xf]  ;;  %v4150_v45 = vld [vmem:[%s5565_s26 + $0xb0] sm:$0x1]  ;;  %v304_v54 = vld [vmem:[%s5565_s26 + $0xcc] sm:$0xf] }
  0x5a   : > { %4545 = vmatpush3.bf16.msra.mxu0 %v5147_v8  ;;  %v5749_v8 = vld [vmem:[%s5565_s26 + $0x40] sm:$0xf]  ;;  %v5791_v50 = vcombine.low %v4134_v43, %v4150_v45  ;;  %v5794_v53 = vcombine.low %v4135_v44, %v4151_v49  ;;  %v4145_v62 = vld [vmem:[%s5565_s26 + $0x104] sm:$0xf]  ;;  %v4153_v2 = vld [vmem:[%s5565_s26 + $0x110] sm:$0x1]  ;;  %v4203_v9 = vcombine.low %v4134_v43, %v4135_v44 }
  0x5b   : > { %4546 = vmatprep.subr.bf16.mxu0 %v5152_v29  ;;  %v4185_v12 = vcombine.low %v5746_v7, %v5749_v8  ;;  %v4202_v29 = vcombine.low %v509_v15, %v516_v16  ;;  %v4136_v63 = vld [vmem:[%s5565_s26 + $0xe0] sm:$0xf]  ;;  %v4146_v5 = vld [vmem:[%s5565_s26 + $0x30] sm:$0x1]  ;;  %v597_v6 = vrot.slane %v595_v52, 1  ;;  %v5178_v32 = vld [vmem:[#allocation3 + $0x38] sm:$0xff]  }
  0x5c   : > { %4585 = vmatpush3.bf16.msra.mxu1 %v5149_v18  ;;  %v4140_v18 = vld [vmem:[%s5565_s26 + $0x64] sm:$0xf]  ;;  %v602_v59 = vshll.u32 %v5791_v50, 16  ;;  %v609_v60 = vshll.u32 %v5794_v53, 16  ;;  %v4137_v0 = vld [vmem:[%s5565_s26 + $0x100] sm:$0xf] }
  0x5d   : > { %1411 = vmatmul.mubr.bf16.gmra.mxu0 %v4206_v28  ;;  %4586 = vmatprep.subr.bf16.mxu1 %v5156_v42  ;;  %v4195_v24 = vcombine.low %v4140_v18, %v4141_v19  ;;  %v4194_v42 = vcombine.low %v4132_v20, %v4133_v27  ;;  %v5182_v49 = vld [vmem:[#allocation3 + $0x20] sm:$0xff]   ;;  %v5185_v52 = vld [vmem:[#allocation3 + $0x68] sm:$0xff]  }
  0x5e   : > { %1516 = vmatprep.mubr.bf16.mxu0 %v4184_v25  ;;  %4547 = vmatpush3.bf16.msra.mxu0 %v5155_v39  ;;  %v4148_v25 = vld [vmem:[%s5565_s26 + $0x70] sm:$0x1]  ;;  %v5168_v39 = vld [vmem:[%s6410_s1 + $0x218] sm:$0xff]   ;;  %v604_v21 = vrot.slane %v602_v59, 1  ;;  %v5825_v59 = vld [vmem:[#allocation3 + $0xf8] sm:$0xff]  }
  0x5f   : > { %4548 = vmatprep.subr.bf16.mxu0 %v5158_v48  ;;  %1476 = vmatmul.mubr.bf16.gmra.mxu1 %v4208_v57  ;;  %v5769_v28 = vcombine.low %v4132_v20, %v4148_v25  ;;  %v4204_v48 = vcombine.low %v4142_v40, %v4143_v41  ;;  %v305_v57 = vld [vmem:[%s5565_s26 + $0xec] sm:$0xf]  ;;  %v600_v20 = vshrl.u32 %v5791_v50, 16  ;;  %v5175_v25 = vld [vmem:[%s6410_s1 + $0x200] sm:$0xff]   ;;  %6422 = vst [vmem:[#allocation9_spill] sm:$0xff] %v5825_v59 }
  0x60   : > { %4587 = vmatpush3.bf16.msra.mxu1 %v5157_v47  ;;  %1581 = vmatprep.mubr.bf16.mxu1 %v4186_v10  ;;  %v530_v47 = vor.u32 %v529_v31, %v525_v30  ;;  %v4210_v10 = vcombine.low %v304_v54, %v305_v57  ;;  %v5183_v50 = vld [vmem:[#allocation3 + $0x70] sm:$0xff]   ;;  %v5187_v54 = vld [vmem:[#allocation3 + $0x60] sm:$0xff]  }
  0x61   : > { %4588 = vmatprep.subr.bf16.mxu1 %v5160_v58  ;;  %v586_v34 = vshrl.u32 %v5769_v28, 16  ;;  %v588_v35 = vshll.u32 %v5769_v28, 16  ;;  %v4144_v58 = vld [vmem:[%s5565_s26 + $0xe4] sm:$0xf]  ;;  %v605_v41 = vor.u32 %v604_v21, %v600_v20  ;;  %v5190_v57 = vld [vmem:[#allocation3] sm:$0xff]  }
  0x62   : > { %4549 = vmatpush3.bf16.msra.mxu0 %v5159_v55  ;;  %v4201_v55 = vcombine.low %v302_v36, %v303_v37  ;;  %v4213_v14 = vcombine.low %v4144_v58, %v4145_v62  ;;  %v598_v37 = vor.u32 %v597_v6, %v593_v38  ;;  %v5365_v38 = vmov 0   ;;  %v5191_v58 = vld [vmem:[#allocation3 + $0x50] sm:$0xff]   ;;  %v5828_v62 = vld [vmem:[#allocation3 + $0xb8] sm:$0xff]  }
  0x63   : > { %4746 = vmatprep.subr.bf16.mxu0 %v5162_v4  ;;  %v590_v51 = vrot.slane %v588_v35, 1  ;;  %1693 = vst [vmem:[#allocation2 + $0x18] sm:$0xf] %v5365_v38  ;;  %1694 = vst [vmem:[#allocation2 + $0x1c] sm:$0x1] %v5365_v38 }
  0x64   : > { %4589 = vmatpush3.bf16.msra.mxu1 %v5161_v61  ;;  %v4211_v61 = vcombine.low %v523_v46, %v530_v47  ;;  %1687 = vst [vmem:[#allocation2] sm:$0xf] %v5365_v38  ;;  %1688 = vst [vmem:[#allocation2 + $0x4] sm:$0x1] %v5365_v38  ;;  %v5180_v47 = vld [vmem:[#allocation3 + $0x28] sm:$0xff]  }
  0x65   : > { %1517 = vmatmul.mubr.bf16.vlgmr.msra.gmra.mxu0 %v4183_v3  ;;  %v591_v36 = vor.u32 %v590_v51, %v586_v34  ;;  %v5179_v34 = vld [vmem:[#allocation3 + $0x30] sm:$0xff]   ;;  %1689 = vst [vmem:[#allocation2 + $0x8] sm:$0xf] %v5365_v38  ;;  %1690 = vst [vmem:[#allocation2 + $0xc] sm:$0x1] %v5365_v38  ;;  %v5184_v51 = vld [vmem:[#allocation3 + $0x18] sm:$0xff]  }
  0x66   : > { %4747 = vmatpush3.bf16.msra.mxu0 %v5162_v4  ;;  %1524 = vmatprep.mubr.bf16.mxu0 %v4193_v1  ;;  %v4152_v1 = vld [vmem:[%s5565_s26 + $0xf0] sm:$0x1]  ;;  %v4177_v4 = vcombine.low %v4137_v0, %v4153_v2  ;;  %1691 = vst [vmem:[#allocation2 + $0x10] sm:$0xf] %v5365_v38  ;;  %1692 = vst [vmem:[#allocation2 + $0x14] sm:$0x1] %v5365_v38 }
  0x67   : > { %4748 = vmatprep.subr.bf16.mxu0 %v5163_v11  ;;  %1582 = vmatmul.mubr.bf16.vlgmr.msra.gmra.mxu1 %v4185_v12  ;;  %v4176_v3 = vcombine.low %v4136_v63, %v4152_v1  ;;  %v4170_v12 = vcombine.low %v5746_v7, %v4146_v5  ;;  %v607_v7 = vshrl.u32 %v5794_v53, 16  ;;  %v4196_v43 = vcombine.low %v591_v36, %v598_v37  ;;  %v5186_v53 = vld [vmem:[#allocation3 + $0x10] sm:$0xff]  }
  0x68   : > { %1589 = vmatprep.mubr.bf16.mxu1 %v4195_v24  ;;  %v623_v16 = vshll.u32 %v4177_v4, 16  ;;  %v611_v24 = vrot.slane %v609_v60, 1  ;;  %v621_v30 = vshrl.u32 %v4177_v4, 16  ;;  %1695 = vst [vmem:[#allocation2 + $0x20] sm:$0xf] %v5365_v38  ;;  %v5194_v60 = vld [vmem:[#allocation3 + $0x48] sm:$0xff]  }
  0x69   : > { %v616_v15 = vshll.u32 %v4176_v3, 16  ;;  %v572_v18 = vshrl.u32 %v4170_v12, 16  ;;  %v574_v19 = vshll.u32 %v4170_v12, 16  ;;  %v614_v27 = vshrl.u32 %v4176_v3, 16  ;;  %1696 = vst [vmem:[#allocation2 + $0x24] sm:$0x1] %v5365_v38 }
  0x6a   : > { %4749 = vmatpush3.bf16.msra.mxu0 %v5163_v11  ;;  %v4147_v11 = vld [vmem:[%s5565_s26 + $0x50] sm:$0x1]  ;;  %v625_v31 = vrot.slane %v623_v16, 1  ;;  %1697 = vst [vmem:[#allocation2 + $0x28] sm:$0xf] %v5365_v38  ;;  %6423 = vst [vmem:[#allocation10_spill] sm:$0xff] %v5828_v62 }
  0x6b   : > { %4750 = vmatprep.subr.bf16.mxu0 %v5164_v17  ;;  %v576_v26 = vrot.slane %v574_v19, 1  ;;  %1698 = vst [vmem:[#allocation2 + $0x2c] sm:$0x1] %v5365_v38  ;;  %1699 = vst [vmem:[#allocation2 + $0x30] sm:$0xf] %v5365_v38 }
  0x6c   : > { %v626_v46 = vor.u32 %v625_v31, %v621_v30  ;;  %1700 = vst [vmem:[#allocation2 + $0x34] sm:$0x1] %v5365_v38  ;;  %1701 = vst [vmem:[#allocation2 + $0x38] sm:$0xf] %v5365_v38 }
  0x6d   : > { %1525 = vmatmul.mubr.bf16.gmra.mxu0 %v4192_v23  ;;  %1702 = vst [vmem:[#allocation2 + $0x3c] sm:$0x1] %v5365_v38  ;;  %1703 = vst [vmem:[#allocation2 + $0x40] sm:$0xf] %v5365_v38 }
  0x6e   : > { %4751 = vmatpush3.bf16.msra.mxu0 %v5164_v17  ;;  %1532 = vmatprep.mubr.bf16.mxu0 %v4202_v29  ;;  %v4171_v17 = vcombine.low %v5749_v8, %v4147_v11  ;;  %v618_v29 = vrot.slane %v616_v15, 1  ;;  %1704 = vst [vmem:[#allocation2 + $0x44] sm:$0x1] %v5365_v38  ;;  %1705 = vst [vmem:[#allocation2 + $0x48] sm:$0xf] %v5365_v38 }
  0x6f   : > { %4752 = vmatprep.subr.bf16.mxu0 %v5167_v33  ;;  %1590 = vmatmul.mubr.bf16.gmra.mxu1 %v4194_v42  ;;  %v612_v42 = vor.u32 %v611_v24, %v607_v7  ;;  %1706 = vst [vmem:[#allocation2 + $0x4c] sm:$0x1] %v5365_v38 }
  0x70   : > { %1597 = vmatprep.mubr.bf16.mxu1 %v4204_v48  ;;  %v579_v22 = vshrl.u32 %v4171_v17, 16  ;;  %v581_v23 = vshll.u32 %v4171_v17, 16  ;;  %v619_v45 = vor.u32 %v618_v29, %v614_v27  ;;  %v5181_v48 = vld [vmem:[#allocation3 + $0x78] sm:$0xff]  }
  0x71   : > { %v4205_v44 = vcombine.low %v605_v41, %v612_v42  ;;  %4770 = vmatprep.subr.bf16.mxu1 %v5181_v48 }
  0x72   : > { %4753 = vmatpush3.bf16.msra.mxu0 %v5167_v33  ;;  %v583_v8 = vrot.slane %v581_v23, 1  ;;  %v577_v33 = vor.u32 %v576_v26, %v572_v18  ;;  %v4214_v28 = vcombine.low %v619_v45, %v626_v46  ;;  %4771 = vmatpush3.bf16.msra.mxu1 %v5181_v48 }
  0x73   : > { %4754 = vmatprep.subr.bf16.mxu0 %v5168_v39  ;;  %4772 = vmatprep.subr.bf16.mxu1 %v5183_v50 }
  0x74   : > { %v584_v35 = vor.u32 %v583_v8, %v579_v22 }
  0x75   : > { %1533 = vmatmul.mubr.bf16.gmra.mxu0 %v4201_v55  ;;  %v5188_v55 = vld [vmem:[#allocation3 + $0x8] sm:$0xff]  }
  0x76   : > { %4755 = vmatpush3.bf16.msra.mxu0 %v5168_v39  ;;  %1540 = vmatprep.mubr.bf16.mxu0 %v4211_v61  ;;  %v4212_v39 = vcombine.low %v4136_v63, %v4137_v0  ;;  %v4187_v40 = vcombine.low %v577_v33, %v584_v35  ;;  %v5197_v61 = vld [vmem:[#allocation3 + $0x40] sm:$0xff]  }
  0x77   : > { %4756 = vmatprep.subr.bf16.mxu0 %v5171_v56  ;;  %1598 = vmatmul.mubr.bf16.gmra.mxu1 %v4203_v9 }
  0x78   : > { %1605 = vmatprep.mubr.bf16.mxu1 %v4213_v14  ;;  %4773 = vmatpush3.bf16.msra.mxu1 %v5183_v50  ;;  %v4178_v50 = vld [vmem:[%s6411_s2] ss:$0 sm:$0xff] }
  0x79   : > { %4774 = vmatprep.subr.bf16.mxu1 %v5185_v52 }
  0x7a   : > { %4757 = vmatpush3.bf16.msra.mxu0 %v5171_v56  ;;  %v5189_v56 = vld [vmem:[#allocation3 + $0x58] sm:$0xff]  }
  0x7b   : > { %4758 = vmatprep.subr.bf16.mxu0 %v5172_v13 }
  0x7c   : > { %4775 = vmatpush3.bf16.msra.mxu1 %v5185_v52 }
  0x7d   : > { %1541 = vmatmul.mubr.bf16.gmra.mxu0 %v4210_v10  ;;  %4776 = vmatprep.subr.bf16.mxu1 %v5187_v54 }
  0x7e   : > { %4759 = vmatpush3.bf16.msra.mxu0 %v5172_v13  ;;  %4762 = vmatprep.mubr.bf16.mxu0 %v4187_v40 }
  0x7f   : > { %4760 = vmatprep.subr.bf16.mxu0 %v5175_v25  ;;  %1606 = vmatmul.mubr.bf16.gmra.mxu1 %v4212_v39 }
  0x80   : > { %4777 = vmatpush3.bf16.msra.mxu1 %v5187_v54 }
  0x81   : > { %4778 = vmatprep.subr.bf16.mxu1 %v5189_v56 }
  0x82   : > { %4761 = vmatpush3.bf16.msra.mxu0 %v5175_v25 }
  0x83   : > { %4794 = vmatprep.subr.bf16.mxu0 %v5178_v32 }
  0x84   : > { %4779 = vmatpush3.bf16.msra.mxu1 %v5189_v56 }
  0x85   : > { %4763 = vmatmul.mubr.bf16.vlgmr.msra.gmra.mxu0 %v4196_v43  ;;  %4780 = vmatprep.subr.bf16.mxu1 %v5191_v58 }
  0x86   : > { %4766 = vmatprep.mubr.bf16.mxu0 %v4205_v44  ;;  %4795 = vmatpush3.bf16.msra.mxu0 %v5178_v32 }
  0x87   : > { %4796 = vmatprep.subr.bf16.mxu0 %v5179_v34 }
  0x88   : > { %4781 = vmatpush3.bf16.msra.mxu1 %v5191_v58 }
  0x89   : > { %4782 = vmatprep.subr.bf16.mxu1 %v5194_v60 }
  0x8a   : > { %4797 = vmatpush3.bf16.msra.mxu0 %v5179_v34 }
  0x8b   : > { %4798 = vmatprep.subr.bf16.mxu0 %v5180_v47 }
  0x8c   : > { %4783 = vmatpush3.bf16.msra.mxu1 %v5194_v60 }
  0x8d   : > { %4767 = vmatmul.mubr.bf16.gmra.mxu0 %v4214_v28  ;;  %4784 = vmatprep.subr.bf16.mxu1 %v5197_v61 }
  0x8e   : > { %4799 = vmatpush3.bf16.msra.mxu0 %v5180_v47 }
  0x8f   : > { %4800 = vmatprep.subr.bf16.mxu0 %v5182_v49 }
  0x90   : > { %4785 = vmatpush3.bf16.msra.mxu1 %v5197_v61 }
  0x91   : > { %4818 = vmatprep.subr.bf16.mxu1 %v5828_v62 }
  0x92   : > { %4801 = vmatpush3.bf16.msra.mxu0 %v5182_v49  ;;  %v5861_v49 = vld [vmem:[#allocation2] sm:$0xf] }
  0x93   : > { %4802 = vmatprep.subr.bf16.mxu0 %v5184_v51  ;;  %6429 = vst [vmem:[#allocation16_spill] sm:$0xff] %v5861_v49  ;;  %v1913_v56 = vshll.u32 %v5861_v49, 16 }
  0x96   : > { %4803 = vmatpush3.bf16.msra.mxu0 %v5184_v51 }
  0x97   : > { %4804 = vmatprep.subr.bf16.mxu0 %v5186_v53 }
  0x9a   : > { %4805 = vmatpush3.bf16.msra.mxu0 %v5186_v53 }
  0x9b   : > { %4806 = vmatprep.subr.bf16.mxu0 %v5188_v55 }
  0x9e   : > { %4807 = vmatpush3.bf16.msra.mxu0 %v5188_v55  ;;  %v1910_v55 = vshrl.u32 %v5861_v49, 16 }
  0x9f   : > { %4808 = vmatprep.subr.bf16.mxu0 %v5190_v57 }
  0xa2   : > { %4809 = vmatpush3.bf16.msra.mxu0 %v5190_v57 }
  0xa3   : > { %4842 = vmatprep.subr.bf16.mxu0 %v5825_v59 }
 0x105   : > { %v4470_v63 = vpop.f32.mrf.mxu0 }
 0x107   : > { %v4471_v0 = vpop.f32.mrf.mxu0  ;;  %v4510_v2 = vpop.f32.mrf.mxu1 }
 0x108   : > { %v4472_v38 = vadd.f32 %v4471_v0, %v4470_v63 }
 0x109   : > { %v4473_v1 = vpop.f32.mrf.mxu0  ;;  %v4511_v4 = vpop.f32.mrf.mxu1 }
 0x10a   : > { %v1389_v57 = vadd.f32 %v4472_v38, %v4178_v50  ;;  %v4512_v0 = vadd.f32 %v4511_v4, %v4510_v2 }
 0x10b   : > { %v4474_v3 = vpop.f32.mrf.mxu0  ;;  %v5831_v6 = vpop.f32.mrf.mxu1 }
 0x10c   : > { %v4475_v58 = vadd.f32 %v4474_v3, %v4473_v1 }
 0x10d   : > { %v4476_v5 = vpop.f32.mrf.mxu0  ;;  %v5833_v10 = vpop.f32.mrf.mxu1 }
 0x10e   : > { %v1392_v49 = vadd.f32 %v4475_v58, %v4178_v50  ;;  %v4515_v2 = vadd.f32 %v5833_v10, %v5831_v6 }
 0x10f   : > { %v4477_v9 = vpop.f32.mrf.mxu0  ;;  %v4516_v12 = vpop.f32.mrf.mxu1 }
 0x110   : > { %v4478_v47 = vadd.f32 %v4477_v9, %v4476_v5 }
 0x111   : > { %v4479_v11 = vpop.f32.mrf.mxu0  ;;  %v4517_v14 = vpop.f32.mrf.mxu1 }
 0x112   : > { %v1397_v60 = vadd.f32 %v4478_v47, %v4178_v50  ;;  %v4518_v61 = vadd.f32 %v4517_v14, %v4516_v12  ;;  %v5872_v12 = vrot.slane %v1913_v56, 5  ;;  %v1454_v14 = vadd.f32 %v4512_v0, %v1389_v57 }
 0x113   : > { %v4480_v13 = vpop.f32.mrf.mxu0  ;;  %v4519_v15 = vpop.f32.mrf.mxu1 }
 0x114   : > { %v4481_v51 = vadd.f32 %v4480_v13, %v4479_v11  ;;  %v1462_v38 = vadd.f32 %v4518_v61, %v1397_v60 }
 0x115   : > { %v4482_v16 = vpop.f32.mrf.mxu0  ;;  %v4520_v18 = vpop.f32.mrf.mxu1 }
 0x116   : > { %v1400_v5 = vadd.f32 %v4481_v51, %v4178_v50  ;;  %v4521_v9 = vadd.f32 %v4520_v18, %v4519_v15 }
 0x117   : > { %v4483_v17 = vpop.f32.mrf.mxu0  ;;  %v5835_v20 = vpop.f32.mrf.mxu1 }
 0x118   : > { %v4484_v62 = vadd.f32 %v4483_v17, %v4482_v16  ;;  %v1465_v4 = vadd.f32 %v4521_v9, %v1400_v5 }
 0x119   : > { %v4485_v19 = vpop.f32.mrf.mxu0  ;;  %v5837_v22 = vpop.f32.mrf.mxu1 }
 0x11a   : > { %v1405_v15 = vadd.f32 %v4484_v62, %v4178_v50 }
 0x11b   : > { %v4486_v21 = vpop.f32.mrf.mxu0  ;;  %v5839_v23 = vpop.f32.mrf.mxu1 }
 0x11d   : > { %v4488_v7 = vpop.f32.mrf.mxu0  ;;  %v5841_v25 = vpop.f32.mrf.mxu1 }
 0x11f   : > { %v4489_v24 = vpop.f32.mrf.mxu0  ;;  %v5843_v29 = vpop.f32.mrf.mxu1 }
 0x121   : > { %v4491_v26 = vpop.f32.mrf.mxu0  ;;  %v5845_v30 = vpop.f32.mrf.mxu1 }
 0x122   : > { %v4530_v6 = vadd.f32 %v5845_v30, %v5843_v29  ;;  %v1457_v30 = vadd.f32 %v4515_v2, %v1392_v49 }
 0x123   : > { %v4492_v27 = vpop.f32.mrf.mxu0  ;;  %v5847_v31 = vpop.f32.mrf.mxu1 }
 0x125   : > { %v4550_v8 = vpop.f32.mrf.mxu0  ;;  %v5849_v35 = vpop.f32.mrf.mxu1 }
 0x126   : > { %v4533_v62 = vadd.f32 %v5849_v35, %v5847_v31 }
 0x127   : > { %v4551_v33 = vpop.f32.mrf.mxu0  ;;  %v5853_v37 = vpop.f32.mrf.mxu1 }
 0x128   : > { %6425 = vst [vmem:[#allocation12_spill] sm:$0xff] %v5853_v37  ;;  %v5870_v37 = vrot.slane %v1910_v55, 4  ;;  %v4552_v1 = vadd.f32 %v4551_v33, %v4550_v8 }
 0x129   : > { %v5851_v36 = vpop.f32.mrf.mxu0  ;;  %v4591_v40 = vpop.f32.mrf.mxu1 }
 0x12a   : > { %6424 = vst [vmem:[#allocation11_spill] sm:$0xff] %v5851_v36  ;;  %v1519_v10 = vadd.f32 %v4552_v1, %v1454_v14 }
 0x12b   : > { %v5855_v39 = vpop.f32.mrf.mxu0  ;;  %v5857_v42 = vpop.f32.mrf.mxu1 }
 0x12c   : > { %6426 = vst [vmem:[#allocation13_spill] sm:$0xff] %v5855_v39  ;;  %6427 = vst [vmem:[#allocation14_spill] sm:$0xff] %v5857_v42  ;;  %v4490_v42 = vadd.f32 %v4489_v24, %v4488_v7  ;;  %v4493_v39 = vadd.f32 %v4492_v27, %v4491_v26  ;;  %v4524_v24 = vadd.f32 %v5837_v22, %v5835_v20 }
 0x12d   : > { %v4556_v41 = vpop.f32.mrf.mxu0  ;;  %v5859_v44 = vpop.f32.mrf.mxu1  ;;  %v4527_v26 = vadd.f32 %v5841_v25, %v5839_v23  ;;  %v1916_v25 = vor.u32 %v5872_v12, %v5870_v37 }
 0x12e   : > { %6428 = vst [vmem:[#allocation15_spill] sm:$0xff] %v5859_v44  ;;  %v4487_v44 = vadd.f32 %v4486_v21, %v4485_v19  ;;  %v1413_v27 = vadd.f32 %v4490_v42, %v4178_v50  ;;  %v1416_v8 = vadd.f32 %v4493_v39, %v4178_v50  ;;  %v1470_v42 = vadd.f32 %v4524_v24, %v1405_v15 }
 0x12f   : > { %v4557_v43 = vpop.f32.mrf.mxu0  ;;  %v4596_v46 = vpop.f32.mrf.mxu1 }
 0x130   : > { %v4558_v11 = vadd.f32 %v4557_v43, %v4556_v41  ;;  %v1408_v17 = vadd.f32 %v4487_v44, %v4178_v50  ;;  %v6430_v41 = vld [vmem:[#allocation12_spill] sm:$0xff]  ;;  %v1478_v51 = vadd.f32 %v4530_v6, %v1413_v27 }
 0x131   : > { %v4559_v45 = vpop.f32.mrf.mxu0  ;;  %v4597_v32 = vpop.f32.mrf.mxu1  ;;  %v4592_v43 = vadd.f32 %v4591_v40, %v6430_v41 }
 0x132   : > { %v1527_v18 = vadd.f32 %v4558_v11, %v1462_v38  ;;  %v4598_v19 = vadd.f32 %v4597_v32, %v4596_v46  ;;  %v6431_v46 = vld [vmem:[#allocation11_spill] sm:$0xff]  ;;  %v1473_v32 = vadd.f32 %v4527_v26, %v1408_v17 }
 0x133   : > { %v4560_v28 = vpop.f32.mrf.mxu0  ;;  %v4599_v48 = vpop.f32.mrf.mxu1  ;;  %v6432_v20 = vld [vmem:[#allocation13_spill] sm:$0xff]  ;;  %v1584_v57 = vadd.f32 %v4592_v43, %v1519_v10  ;;  %v6433_v58 = vld [vmem:[#allocation14_spill] sm:$0xff] }
 0x134   : > { %v4561_v21 = vadd.f32 %v4560_v28, %v4559_v45  ;;  %v5885_v45 = vld [vmem:[#allocation2 + $0x4] sm:$0x1]  ;;  %v4555_v22 = vadd.f32 %v6432_v20, %v6431_v46  ;;  %v1592_v40 = vadd.f32 %v4598_v19, %v1527_v18  ;;  %v5895_v19 = vrot.slane %v1916_v25, 4  ;;  %v1841_v46 = vld [vmem:[#allocation2 + $0x1c] sm:$0x1] }
 0x135   : > { %v4562_v34 = vpop.f32.mrf.mxu0  ;;  %v4600_v53 = vpop.f32.mrf.mxu1  ;;  %v1919_v29 = vshll.u32 %v5885_v45, 16  ;;  %v6434_v60 = vld [vmem:[#allocation15_spill] sm:$0xff] }
 0x136   : > { %v1530_v31 = vadd.f32 %v4561_v21, %v1465_v4  ;;  %v4601_v35 = vadd.f32 %v4600_v53, %v4599_v48  ;;  %v1522_v37 = vadd.f32 %v4555_v22, %v1457_v30  ;;  %v4595_v49 = vadd.f32 %v6434_v60, %v6433_v58 }
 0x137   : > { %v4563_v52 = vpop.f32.mrf.mxu0  ;;  %v5868_v63 = vpop.f32.mrf.mxu1  ;;  %v5897_v24 = vrot.slane %v1919_v29, 5 }
 0x138   : > { %v4564_v28 = vadd.f32 %v4563_v52, %v4562_v34  ;;  %v1481_v52 = vadd.f32 %v4533_v62, %v1416_v8  ;;  %v1587_v17 = vadd.f32 %v4595_v49, %v1522_v37  ;;  %v6442_v62 = vld [vmem:[#allocation9_spill] sm:$0xff] }
 0x139   : > { %v4565_v54 = vpop.f32.mrf.mxu0  ;;  %v4603_v13 = vpop.f32.mrf.mxu1 }
 0x13a   : > { %v1535_v61 = vadd.f32 %v4564_v28, %v1470_v42  ;;  %v4604_v0 = vadd.f32 %v4603_v13, %v5868_v63 }
 0x13b   : > { %v4566_v59 = vpop.f32.mrf.mxu0  ;;  %v4605_v3 = vpop.f32.mrf.mxu1 }
 0x13c   : > { %v4567_v47 = vadd.f32 %v4566_v59, %v4565_v54  ;;  %v1595_v59 = vadd.f32 %v4601_v35, %v1530_v31  ;;  %v1600_v27 = vadd.f32 %v4604_v0, %v1535_v61  ;;  %v1847_v0 = vld [vmem:[#allocation2 + $0x24] sm:$0x1] }
 0x13d   : > { %v4568_v36 = vpop.f32.mrf.mxu0  ;;  %v4606_v7 = vpop.f32.mrf.mxu1 }
 0x13e   : > { %v4607_v54 = vadd.f32 %v4606_v7, %v4605_v3 }
 0x13f   : > { %v4569_v16 = vpop.f32.mrf.mxu0  ;;  %v4608_v44 = vpop.f32.mrf.mxu1 }
 0x140   : > { %v4570_v50 = vadd.f32 %v4569_v16, %v4568_v36  ;;  %v1538_v36 = vadd.f32 %v4567_v47, %v1473_v32 }
 0x141   : > { %v4571_v33 = vpop.f32.mrf.mxu0  ;;  %v4609_v39 = vpop.f32.mrf.mxu1 }
 0x142   : > { %v1543_v38 = vadd.f32 %v4570_v50, %v1478_v51  ;;  %v4610_v1 = vadd.f32 %v4609_v39, %v4608_v44  ;;  %v1603_v8 = vadd.f32 %v4607_v54, %v1538_v36  ;;  %v1838_v44 = vld [vmem:[#allocation2 + $0x18] sm:$0xf]  ;;  %v1823_v39 = vld [vmem:[#allocation2 + $0x8] sm:$0xf] }
 0x143   : > { %v4572_v23 = vpop.f32.mrf.mxu0  ;;  %v4611_v55 = vpop.f32.mrf.mxu1 }
 0x144   : > { %v4573_v48 = vadd.f32 %v4572_v23, %v4571_v33  ;;  %v1608_v7 = vadd.f32 %v4610_v1, %v1543_v38  ;;  %v1832_v1 = vld [vmem:[#allocation2 + $0x10] sm:$0xf]  ;;  %v5254_v38 = vld [vmem:[#allocation3 + $0x230] sm:$0xff]  }
 0x145   : > { %v4764_v34 = vpop.f32.mrf.mxu0  ;;  %v4612_v5 = vpop.f32.mrf.mxu1 }
 0x146   : > { %v1657_v56 = vadd.f32 %v4764_v34, %v1592_v40  ;;  %v1546_v15 = vadd.f32 %v4573_v48, %v1481_v52  ;;  %v4613_v16 = vadd.f32 %v4612_v5, %v4611_v55  ;;  %v1829_v40 = vld [vmem:[#allocation2 + $0xc] sm:$0x1] }
 0x147   : > { %v1648_v53 = vpop.f32.mrf.mxu0 }
 0x148   : > { %v1681_v9 = vmax.f32 %v1657_v56, 0.0  ;;  %v1649_v11 = vadd.f32 %v1648_v53, %v1584_v57  ;;  %v1611_v25 = vadd.f32 %v4613_v16, %v1546_v15  ;;  %v1844_v53 = vld [vmem:[#allocation2 + $0x20] sm:$0xf]  ;;  %v1922_v15 = vsel %vm5921_vm8, %v5895_v19, %v5897_v24 }
 0x149   : > { %v4765_v12 = vpop.f32.mrf.mxu0 }
 0x14a   : > { %v4447_v14 = vpack.c.bf16 %v1681_v9, %v1681_v9  ;;  %v1679_v2 = vmax.f32 %v1649_v11, 0.0  ;;  %v1660_v4 = vadd.f32 %v4765_v12, %v1595_v59  ;;  %v1835_v12 = vld [vmem:[#allocation2 + $0x14] sm:$0x1] }
 0x14b   : > { %v1651_v18 = vpop.f32.mrf.mxu0 }
 0x14c   : > { %v1756_v63 = vshrl.u32 %v4447_v14, 16  ;;  %v4445_v13 = vpack.c.bf16 %v1679_v2, %v1679_v2  ;;  %v1682_v21 = vmax.f32 %v1660_v4, 0.0  ;;  %v1652_v3 = vadd.f32 %v1651_v18, %v1587_v17 }
 0x14d   : > { %v4768_v26 = vpop.f32.mrf.mxu0  ;;  %v1759_v6 = vshll.u32 %v4447_v14, 16 }
 0x14e   : > { %v1758_v33 = vrot.slane %v1756_v63, 7  ;;  %v1740_v10 = vshrl.u32 %v4445_v13, 16  ;;  %v4448_v41 = vpack.c.bf16 %v1682_v21, %v1682_v21  ;;  %v1743_v20 = vshll.u32 %v4445_v13, 16 }
 0x14f   : > { %v1680_v22 = vmax.f32 %v1652_v3, 0.0  ;;  %v1673_v28 = vadd.f32 %v4768_v26, %v1608_v7  ;;  %v1664_v23 = vpop.f32.mrf.mxu0  ;;  %v1862_v3 = vld [vmem:[#allocation2 + $0x38] sm:$0xf] }
 0x150   : > { %v1761_v29 = vor.u32 %v1759_v6, %v1758_v33  ;;  %v1762_v30 = vrot.slane %v1758_v33, 4  ;;  %v1742_v31 = vrot.slane %v1740_v10, 7  ;;  %v1764_v35 = vshrl.u32 %v4448_v41, 16  ;;  %v1865_v33 = vld [vmem:[#allocation2 + $0x3c] sm:$0x1] }
 0x151   : > { %v1767_v42 = vshll.u32 %v4448_v41, 16  ;;  %v4446_v32 = vpack.c.bf16 %v1680_v22, %v1680_v22  ;;  %v1685_v47 = vmax.f32 %v1673_v28, 0.0  ;;  %v1665_v50 = vadd.f32 %v1664_v23, %v1600_v27  ;;  %v4769_v34 = vpop.f32.mrf.mxu0  ;;  %v1850_v10 = vld [vmem:[#allocation2 + $0x28] sm:$0xf]  ;;  %v1853_v23 = vld [vmem:[#allocation2 + $0x2c] sm:$0x1] }
 0x152   : > { %v1839_v51 = vsel %vm5901_vm6, %v1761_v29, %v1838_v44  ;;  %v1842_v52 = vsel %vm5907_vm7, %v1762_v30, %v1841_v46  ;;  %v1745_v55 = vor.u32 %v1743_v20, %v1742_v31  ;;  %v1746_v56 = vrot.slane %v1742_v31, 4 }
 0x153   : > { %1840 = vst [vmem:[#allocation2 + $0x18] sm:$0xf] %v1839_v51  ;;  %1843 = vst [vmem:[#allocation2 + $0x1c] sm:$0x1] %v1842_v52  ;;  %v1766_v57 = vrot.slane %v1764_v35, 7  ;;  %v1748_v37 = vshrl.u32 %v4446_v32, 16  ;;  %v4451_v60 = vpack.c.bf16 %v1685_v47, %v1685_v47  ;;  %v1667_v49 = vpop.f32.mrf.mxu0  ;;  %v1676_v9 = vadd.f32 %v4769_v34, %v1611_v25 }
 0x154   : > { %v1751_v58 = vshll.u32 %v4446_v32, 16  ;;  %v1824_v61 = vsel %vm5901_vm6, %v1745_v55, %v1823_v39  ;;  %v1830_v48 = vsel %vm5907_vm7, %v1746_v56, %v1829_v40  ;;  %v1683_v5 = vmax.f32 %v1665_v50, 0.0  ;;  %v1868_v32 = vld [vmem:[#allocation2 + $0x40] sm:$0xf]  ;;  %v1871_v47 = vld [vmem:[#allocation2 + $0x44] sm:$0x1] }
 0x155   : > { %1825 = vst [vmem:[#allocation2 + $0x8] sm:$0xf] %v1824_v61  ;;  %1831 = vst [vmem:[#allocation2 + $0xc] sm:$0x1] %v1830_v48  ;;  %v1769_v11 = vor.u32 %v1767_v42, %v1766_v57  ;;  %v1770_v59 = vrot.slane %v1766_v57, 4  ;;  %v1750_v36 = vrot.slane %v1748_v37, 7  ;;  %v1668_v4 = vadd.f32 %v1667_v49, %v1603_v8 }
 0x156   : > { %v1788_v54 = vshrl.u32 %v4451_v60, 16  ;;  %v4449_v14 = vpack.c.bf16 %v1683_v5, %v1683_v5  ;;  %v1686_v2 = vmax.f32 %v1676_v9, 0.0  ;;  %v1791_v21 = vshll.u32 %v4451_v60, 16  ;;  %v1856_v37 = vld [vmem:[#allocation2 + $0x30] sm:$0xf]  ;;  %v6441_v49 = vld [vmem:[#allocation16_spill] sm:$0xff] }
 0x157   : > { %v1845_v16 = vsel %vm5901_vm6, %v1769_v11, %v1844_v53  ;;  %v1848_v17 = vsel %vm5907_vm7, %v1770_v59, %v1847_v0  ;;  %v1753_v18 = vor.u32 %v1751_v58, %v1750_v36  ;;  %v1754_v63 = vrot.slane %v1750_v36, 4  ;;  %v1859_v58 = vld [vmem:[#allocation2 + $0x34] sm:$0x1] }
 0x158   : > { %1846 = vst [vmem:[#allocation2 + $0x20] sm:$0xf] %v1845_v16  ;;  %1849 = vst [vmem:[#allocation2 + $0x24] sm:$0x1] %v1848_v17  ;;  %v1790_v13 = vrot.slane %v1788_v54, 7  ;;  %v1772_v7 = vshrl.u32 %v4449_v14, 16  ;;  %v4452_v26 = vpack.c.bf16 %v1686_v2, %v1686_v2 }
 0x159   : > { %v1833_v27 = vsel %vm5901_vm6, %v1753_v18, %v1832_v1  ;;  %v1836_v8 = vsel %vm5907_vm7, %v1754_v63, %v1835_v12  ;;  %v1775_v6 = vshll.u32 %v4449_v14, 16  ;;  %v1684_v41 = vmax.f32 %v1668_v4, 0.0 }
 0x15a   : > { %1834 = vst [vmem:[#allocation2 + $0x10] sm:$0xf] %v1833_v27  ;;  %1837 = vst [vmem:[#allocation2 + $0x14] sm:$0x1] %v1836_v8  ;;  %v1793_v44 = vor.u32 %v1791_v21, %v1790_v13  ;;  %v1794_v46 = vrot.slane %v1790_v13, 4  ;;  %v1774_v20 = vrot.slane %v1772_v7, 7 }
 0x15b   : > { %v1796_v22 = vshrl.u32 %v4452_v26, 16  ;;  %v1877_v28 = vld [vmem:[#allocation2 + $0x18] sm:$0xf]  ;;  %v1799_v25 = vshll.u32 %v4452_v26, 16  ;;  %v4450_v29 = vpack.c.bf16 %v1684_v41, %v1684_v41  ;;  %v5196_v21 = vld [vmem:[#allocation3 + $0xf0] sm:$0xff]  }
 0x15c   : > { %v1952_v30 = vshrl.u32 %v1877_v28, 16  ;;  %v1955_v31 = vshll.u32 %v1877_v28, 16  ;;  %v1863_v35 = vsel %vm5901_vm6, %v1793_v44, %v1862_v3  ;;  %v1866_v39 = vsel %vm5907_vm7, %v1794_v46, %v1865_v33  ;;  %v1875_v50 = vld [vmem:[#allocation2 + $0x8] sm:$0xf]  ;;  %v5946_v1 = vld [vmem:[#allocation2 + $0xc] sm:$0x1] }
 0x15d   : > { %v1777_v40 = vor.u32 %v1775_v6, %v1774_v20  ;;  %v1778_v42 = vrot.slane %v1774_v20, 4  ;;  %1864 = vst [vmem:[#allocation2 + $0x38] sm:$0xf] %v1863_v35  ;;  %1867 = vst [vmem:[#allocation2 + $0x3c] sm:$0x1] %v1866_v39  ;;  %v1798_v34 = vrot.slane %v1796_v22, 7  ;;  %v4307_v61 = vcombine.low %v6441_v49, %v1875_v50 }
 0x15e   : > { %v1780_v51 = vshrl.u32 %v4450_v29, 16  ;;  %v1783_v52 = vshll.u32 %v4450_v29, 16  ;;  %v1924_v55 = vshrl.u32 %v1875_v50, 16  ;;  %v1927_v60 = vshll.u32 %v1875_v50, 16  ;;  %v5199_v41 = vld [vmem:[#allocation3 + $0xe8] sm:$0xff]  }
 0x15f   : > { %v1851_v56 = vsel %vm5901_vm6, %v1777_v40, %v1850_v10  ;;  %v1854_v57 = vsel %vm5907_vm7, %v1778_v42, %v1853_v23  ;;  %v1801_v48 = vor.u32 %v1799_v25, %v1798_v34  ;;  %v1802_v53 = vrot.slane %v1798_v34, 4  ;;  %v1878_v9 = vld [vmem:[#allocation2 + $0x20] sm:$0xf]  ;;  %4810 = vmatprep.mubr.bf16.mxu0 %v4307_v61  ;;  %v5961_v46 = vld [vmem:[#allocation2 + $0x1c] sm:$0x1]  ;;  %v5203_v61 = vld [vmem:[#allocation3 + $0xe0] sm:$0xff]  }
 0x160   : > { %1852 = vst [vmem:[#allocation2 + $0x28] sm:$0xf] %v1851_v56  ;;  %1855 = vst [vmem:[#allocation2 + $0x2c] sm:$0x1] %v1854_v57  ;;  %v1782_v0 = vrot.slane %v1780_v51, 7  ;;  %v1926_v5 = vrot.slane %v1924_v55, 4 }
 0x161   : > { %v1929_v11 = vrot.slane %v1927_v60, 5  ;;  %v1954_v59 = vrot.slane %v1952_v30, 4  ;;  %v1957_v36 = vrot.slane %v1955_v31, 5  ;;  %v1966_v54 = vshrl.u32 %v1878_v9, 16  ;;  %v1876_v16 = vld [vmem:[#allocation2 + $0x10] sm:$0xf] }
 0x162   : > { %v1869_v12 = vsel %vm5901_vm6, %v1801_v48, %v1868_v32  ;;  %v1872_v14 = vsel %vm5907_vm7, %v1802_v53, %v1871_v47  ;;  %v1785_v2 = vor.u32 %v1783_v52, %v1782_v0  ;;  %v1786_v4 = vrot.slane %v1782_v0, 4  ;;  %v5952_v17 = vld [vmem:[#allocation2 + $0x14] sm:$0x1]  ;;  %v5965_v25 = vld [vmem:[#allocation2 + $0x24] sm:$0x1] }
 0x163   : > { %1870 = vst [vmem:[#allocation2 + $0x40] sm:$0xf] %v1869_v12  ;;  %1873 = vst [vmem:[#allocation2 + $0x44] sm:$0x1] %v1872_v14  ;;  %v1938_v18 = vshrl.u32 %v1876_v16, 16  ;;  %v1941_v63 = vshll.u32 %v1876_v16, 16  ;;  %v4308_v13 = vcombine.low %v1876_v16, %v1877_v28  ;;  %v1930_v8 = vor.u32 %v1929_v11, %v1926_v5 }
 0x164   : > { %v5954_v3 = vrot.slane %v1966_v54, 4  ;;  %v1857_v7 = vsel %vm5901_vm6, %v1785_v2, %v1856_v37  ;;  %v1860_v26 = vsel %vm5907_vm7, %v1786_v4, %v1859_v58  ;;  %v1969_v27 = vshll.u32 %v1878_v9, 16  ;;  %v1881_v44 = vld [vmem:[#allocation2 + $0x38] sm:$0xf]  ;;  %v5967_v40 = vld [vmem:[#allocation2 + $0x3c] sm:$0x1] }
 0x165   : > { %1858 = vst [vmem:[#allocation2 + $0x30] sm:$0xf] %v1857_v7  ;;  %1861 = vst [vmem:[#allocation2 + $0x34] sm:$0x1] %v1860_v26  ;;  %v1940_v33 = vrot.slane %v1938_v18, 4  ;;  %v1943_v6 = vrot.slane %v1941_v63, 5  ;;  %4811 = vmatmul.mubr.bf16.vlgmr.msra.gmra.mxu0 %v4308_v13  ;;  %v1958_v39 = vor.u32 %v1957_v36, %v1954_v59 }
 0x166   : > { %v1933_v10 = vshll.u32 %v5946_v1, 16  ;;  %v1947_v20 = vshll.u32 %v5952_v17, 16  ;;  %4843 = vmatpush3.bf16.msra.mxu0 %v6442_v62  ;;  %v1971_v22 = vrot.slane %v1969_v27, 5  ;;  %v1931_v43 = vrot.slane %v1930_v8, 4  ;;  %v2303_v5 = vld [vmem:[#allocation2] sm:$0xe] }
 0x167   : > { %v2008_v28 = vshrl.u32 %v1881_v44, 16  ;;  %v2011_v23 = vshll.u32 %v1881_v44, 16  ;;  %4844 = vmatprep.subr.bf16.mxu0 %v5196_v21  ;;  %v1879_v29 = vld [vmem:[#allocation2 + $0x28] sm:$0xf]  ;;  %v1944_v31 = vor.u32 %v1943_v6, %v1940_v33  ;;  %v5969_v34 = vld [vmem:[#allocation2 + $0x2c] sm:$0x1] }
 0x168   : > { %v1935_v30 = vrot.slane %v1933_v10, 5  ;;  %v1949_v35 = vrot.slane %v1947_v20, 5  ;;  %v1980_v42 = vshrl.u32 %v1879_v29, 16  ;;  %v1983_v32 = vshll.u32 %v1879_v29, 16  ;;  %v2304_v36 = vld [vmem:[#allocation2 + $0x8] sm:$0xe] }
 0x169   : > { %v4309_v47 = vcombine.low %v1878_v9, %v1879_v29  ;;  %v2010_v50 = vrot.slane %v2008_v28, 4  ;;  %v2013_v52 = vrot.slane %v2011_v23, 5  ;;  %v1945_v55 = vrot.slane %v1944_v31, 4  ;;  %v5202_v16 = vld [vmem:[#allocation2 + $0x8] ss:$8 sps:$4 sm:$0xff]   ;;  %v5204_v26 = vld [vmem:[#allocation3 + $0xb0] sm:$0xff]  }
 0x16a   : > { %v1936_v51 = vsel %vm5921_vm8, %v1931_v43, %v1935_v30  ;;  %v1959_v56 = vrot.slane %v1958_v39, 4  ;;  %v1982_v57 = vrot.slane %v1980_v42, 4  ;;  %v1985_v37 = vrot.slane %v1983_v32, 5  ;;  %4845 = vmatpush3.bf16.msra.mxu0 %v5196_v21  ;;  %v5205_v6 = vld [vmem:[#allocation3 + $0xd8] sm:$0xff]   ;;  %v6443_v43 = vld [vmem:[#allocation10_spill] sm:$0xff] }
 0x16b   : > { %4814 = vmatprep.mubr.bf16.mxu0 %v4309_v47  ;;  %v4295_v58 = vcombine.low %v1922_v15, %v1936_v51  ;;  %v1961_v60 = vshll.u32 %v5961_v46, 16  ;;  %4846 = vmatprep.subr.bf16.mxu0 %v5199_v41  ;;  %v1950_v49 = vsel %vm5921_vm8, %v1945_v55, %v1949_v35  ;;  %v1972_v48 = vor.u32 %v1971_v22, %v5954_v3  ;;  %v5206_v23 = vld [vmem:[#allocation3 + $0xa8] sm:$0xff]   ;;  %v5207_v35 = vld [vmem:[#allocation3 + $0xd0] sm:$0xff]   ;;  %v5210_v55 = vld [vmem:[#allocation3 + $0x98] sm:$0xff]  }
 0x16c   : > { %v1975_v53 = vshll.u32 %v5965_v25, 16  ;;  %v1989_v0 = vshll.u32 %v5969_v34, 16  ;;  %v1880_v9 = vld [vmem:[#allocation2 + $0x30] sm:$0xf]  ;;  %v1986_v59 = vor.u32 %v1985_v37, %v1982_v57  ;;  %v5984_v19 = vld [vmem:[#allocation2 + $0x34] sm:$0x1]  ;;  %v2014_v24 = vor.u32 %v2013_v52, %v2010_v50 }
 0x16d   : > { %4786 = vmatprep.mubr.bf16.mxu1 %v4295_v58  ;;  %v1963_v11 = vrot.slane %v1961_v60, 5  ;;  %v2017_v15 = vshll.u32 %v5967_v40, 16  ;;  %v1994_v54 = vshrl.u32 %v1880_v9, 16  ;;  %v1997_v12 = vshll.u32 %v1880_v9, 16  ;;  %v5208_v50 = vld [vmem:[#allocation3 + $0xa0] sm:$0xff]   ;;  %v5209_v52 = vld [vmem:[#allocation3 + $0xc8] sm:$0xff]  }
 0x16e   : > { %v4310_v14 = vcombine.low %v1880_v9, %v1881_v44  ;;  %v1973_v2 = vrot.slane %v1972_v48, 4  ;;  %4847 = vmatpush3.bf16.msra.mxu0 %v5199_v41  ;;  %v1977_v18 = vrot.slane %v1975_v53, 5  ;;  %v1987_v63 = vrot.slane %v1986_v59, 4  ;;  %v5212_v57 = vld [vmem:[#allocation3 + $0x90] sm:$0xff]   ;;  %v5214_v37 = vld [vmem:[#allocation3 + $0x178] sm:$0xff]   ;;  %v5215_v58 = vld [vmem:[#allocation3 + $0x88] sm:$0xff]  }
 0x16f   : > { %v1964_v4 = vsel %vm5921_vm8, %v1959_v56, %v1963_v11  ;;  %v1991_v13 = vrot.slane %v1989_v0, 5  ;;  %v1996_v21 = vrot.slane %v1994_v54, 4  ;;  %v1999_v3 = vrot.slane %v1997_v12, 5  ;;  %4848 = vmatprep.subr.bf16.mxu0 %v5203_v61  ;;  %v5211_v56 = vld [vmem:[#allocation3 + $0xc0] sm:$0xff]   ;;  %v5213_v60 = vld [vmem:[#allocation2 + $0x18] ss:$8 sps:$4 sm:$0xff]  }
 0x170   : > { %4815 = vmatmul.mubr.bf16.gmra.mxu0 %v4310_v14  ;;  %v4296_v7 = vcombine.low %v1950_v49, %v1964_v4  ;;  %v2003_v27 = vshll.u32 %v5984_v19, 16  ;;  %v1978_v8 = vsel %vm5921_vm8, %v1973_v2, %v1977_v18  ;;  %v4319_v10 = vrot.slane %v2303_v5, 9  ;;  %v2305_v49 = vld [vmem:[#allocation2 + $0x10] sm:$0xe]  ;;  %v5217_v53 = vld [vmem:[#allocation3 + $0x170] sm:$0xff]  }
 0x171   : > { %4858 = vmatprep.mubr.bf16.mxu0 %v5202_v16  ;;  %v1992_v33 = vsel %vm5921_vm8, %v1987_v63, %v1991_v13  ;;  %v2332_v41 = vrot.slane %v5885_v45, 5  ;;  %v2000_v20 = vor.u32 %v1999_v3, %v1996_v21  ;;  %v2015_v62 = vrot.slane %v2014_v24, 4  ;;  %v5216_v48 = vld [vmem:[#allocation2 + $0x28] ss:$8 sps:$4 sm:$0xff]   ;;  %v2306_v0 = vld [vmem:[#allocation2 + $0x18] sm:$0xe] }
 0x172   : > { %4787 = vmatmul.mubr.bf16.vlgmr.msra.gmra.mxu1 %v4296_v7  ;;  %v4297_v44 = vcombine.low %v1978_v8, %v1992_v33  ;;  %v4320_v22 = vrot.slane %v2304_v36, 9  ;;  %4849 = vmatpush3.bf16.msra.mxu0 %v5203_v61  ;;  %v2336_v28 = vrot.slane %v5946_v1, 5  ;;  %v2005_v30 = vrot.slane %v2003_v27, 5  ;;  %v2686_v61 = vld [vmem:[#allocation2 + $0x10] sm:$0xf] }
 0x173   : > { %4819 = vmatpush3.bf16.msra.mxu1 %v6443_v43  ;;  %v2001_v29 = vrot.slane %v2000_v20, 4  ;;  %v2019_v31 = vrot.slane %v2017_v15, 5  ;;  %4850 = vmatprep.subr.bf16.mxu0 %v5205_v6  ;;  %v2333_v42 = vsel %vm5999_vm11, %v4319_v10, %v2332_v41  ;;  %v6011_v5 = vld [vmem:[#allocation2 + $0x14] sm:$0x1]  ;;  %v2966_v9 = vld [vmem:[#allocation2 + $0x10] sm:$0xe] }
 0x174   : > { %4820 = vmatprep.subr.bf16.mxu1 %v5204_v26  ;;  %4790 = vmatprep.mubr.bf16.mxu1 %v4297_v44  ;;  %v2337_v32 = vsel %vm5999_vm11, %v4320_v22, %v2336_v28  ;;  %v6013_v11 = vld [vmem:[#allocation2 + $0xc] sm:$0x1]  ;;  %v2965_v59 = vld [vmem:[#allocation2 + $0x8] sm:$0xe]  ;;  %v4321_v15 = vrot.slane %v2305_v49, 9  ;;  %v2340_v36 = vrot.slane %v5952_v17, 5 }
 0x175   : > { %v2006_v39 = vsel %vm5921_vm8, %v2001_v29, %v2005_v30  ;;  %v2020_v1 = vsel %vm5921_vm8, %v2015_v62, %v2019_v31  ;;  %v4327_v51 = vcombine.low %v2333_v42, %v2337_v32  ;;  %v2684_v24 = vld [vmem:[#allocation2 + $0x8] sm:$0xf]  ;;  %v2715_v54 = vshrl.u32 %v2686_v61, 16  ;;  %v5218_v16 = vld [vmem:[#allocation3 + $0x80] sm:$0xff]   ;;  %v2307_v7 = vld [vmem:[#allocation2 + $0x20] sm:$0xe] }
 0x176   : > { %4851 = vmatpush3.bf16.msra.mxu0 %v5205_v6  ;;  %v4298_v47 = vcombine.low %v2006_v39, %v2020_v1  ;;  %v2718_v12 = vshll.u32 %v2686_v61, 16  ;;  %v4364_v14 = vrot.slane %v2966_v9, 9  ;;  %v2995_v2 = vrot.slane %v6011_v5, 5  ;;  %v2308_v4 = vld [vmem:[#allocation2 + $0x28] sm:$0xe]  ;;  %v5222_v31 = vld [vmem:[#allocation3 + $0x160] sm:$0xff]  }
 0x177   : > { %4821 = vmatpush3.bf16.msra.mxu1 %v5204_v26  ;;  %4852 = vmatprep.subr.bf16.mxu0 %v5207_v35  ;;  %v2701_v18 = vshrl.u32 %v2684_v24, 16  ;;  %v2704_v63 = vshll.u32 %v2684_v24, 16  ;;  %v4322_v13 = vrot.slane %v2306_v0, 9  ;;  %v2344_v21 = vrot.slane %v5961_v46, 5  ;;  %v5220_v26 = vld [vmem:[#allocation3 + $0x168] sm:$0xff]   ;;  %v5221_v41 = vld [vmem:[#allocation3 + $0x138] sm:$0xff]  }
 0x178   : > { %4822 = vmatprep.subr.bf16.mxu1 %v5206_v23  ;;  %v4363_v3 = vrot.slane %v2965_v59, 9  ;;  %v2991_v17 = vrot.slane %v6013_v11, 5  ;;  %v4324_v27 = vrot.slane %v2308_v4, 9  ;;  %v2352_v8 = vrot.slane %v5969_v34, 5  ;;  %v2309_v62 = vld [vmem:[#allocation2 + $0x30] sm:$0xe] }
 0x179   : > { %v2717_v33 = vrot.slane %v2715_v54, 4  ;;  %v2720_v6 = vrot.slane %v2718_v12, 5  ;;  %v2341_v10 = vsel %vm5999_vm11, %v4321_v15, %v2340_v36  ;;  %v2996_v44 = vsel %vm5999_vm11, %v4364_v14, %v2995_v2  ;;  %v5219_v28 = vld [vmem:[#allocation2 + $0x38] ss:$8 sps:$4 sm:$0xff]   ;;  %v6037_v49 = vld [vmem:[#allocation2 + $0x1c] sm:$0x1] }
 0x17a   : > { %4791 = vmatmul.mubr.bf16.gmra.mxu1 %v4298_v47  ;;  %4853 = vmatpush3.bf16.msra.mxu0 %v5207_v35  ;;  %v4323_v46 = vrot.slane %v2307_v7, 9  ;;  %v2348_v20 = vrot.slane %v5965_v25, 5  ;;  %v2703_v22 = vrot.slane %v2701_v18, 4  ;;  %v2706_v43 = vrot.slane %v2704_v63, 5  ;;  %v2310_v39 = vld [vmem:[#allocation2 + $0x38] sm:$0xe] }
 0x17b   : > { %4823 = vmatpush3.bf16.msra.mxu1 %v5206_v23  ;;  %4834 = vmatprep.mubr.bf16.mxu1 %v4327_v51  ;;  %v2992_v34 = vsel %vm5999_vm11, %v4363_v3, %v2991_v17  ;;  %v2345_v23 = vsel %vm5999_vm11, %v4322_v13, %v2344_v21  ;;  %v2353_v30 = vsel %vm5999_vm11, %v4324_v27, %v2352_v8  ;;  %v4325_v1 = vrot.slane %v2309_v62, 9  ;;  %v5223_v32 = vld [vmem:[#allocation3 + $0x130] sm:$0xff]   ;;  %v2967_v0 = vld [vmem:[#allocation2 + $0x18] sm:$0xe]  ;;  %v6047_v36 = vld [vmem:[#allocation2 + $0x2c] sm:$0x1] }
 0x17c   : > { %4824 = vmatprep.subr.bf16.mxu1 %v5208_v50  ;;  %4854 = vmatprep.subr.bf16.mxu0 %v5209_v52  ;;  %v4371_v29 = vcombine.low %v2992_v34, %v2996_v44  ;;  %v2721_v35 = vor.u32 %v2720_v6, %v2717_v33  ;;  %v4328_v25 = vcombine.low %v2341_v10, %v2345_v23  ;;  %v2356_v47 = vrot.slane %v5984_v19, 5  ;;  %v5226_v59 = vld [vmem:[#allocation3 + $0x150] sm:$0xff]   ;;  %v5227_v12 = vld [vmem:[#allocation3 + $0x120] sm:$0xff]   ;;  %v5228_v63 = vld [vmem:[#allocation3 + $0x148] sm:$0xff]  }
 0x17d   : > { %v2349_v42 = vsel %vm5999_vm11, %v4323_v46, %v2348_v20  ;;  %v2724_v51 = vshll.u32 %v6011_v5, 16  ;;  %v2968_v5 = vld [vmem:[#allocation2 + $0x20] sm:$0xe]  ;;  %v4365_v15 = vrot.slane %v2967_v0, 9  ;;  %v2999_v14 = vrot.slane %v6037_v49, 5  ;;  %v5229_v33 = vld [vmem:[#allocation3 + $0x118] sm:$0xff]  }
 0x17e   : > { %4855 = vmatpush3.bf16.msra.mxu0 %v5209_v52  ;;  %v4329_v52 = vcombine.low %v2349_v42, %v2353_v30  ;;  %v2357_v19 = vsel %vm5999_vm11, %v4325_v1, %v2356_v47  ;;  %v4366_v2 = vrot.slane %v2968_v5, 9  ;;  %v3344_v13 = vld [vmem:[#allocation2 + $0x10] sm:$0xf]  ;;  %v6053_v21 = vld [vmem:[#allocation2 + $0x34] sm:$0x1] }
 0x17f   : > { %4825 = vmatpush3.bf16.msra.mxu1 %v5208_v50  ;;  %4856 = vmatprep.subr.bf16.mxu0 %v5211_v56  ;;  %v2707_v50 = vor.u32 %v2706_v43, %v2703_v22  ;;  %v2970_v3 = vld [vmem:[#allocation2 + $0x30] sm:$0xe]  ;;  %v2690_v17 = vld [vmem:[#allocation2 + $0x20] sm:$0xf]  ;;  %v3346_v27 = vld [vmem:[#allocation2 + $0x18] sm:$0xf]  ;;  %v6058_v10 = vsel %vm5999_vm11, %v4365_v15, %v2999_v14 }
 0x180   : > { %4826 = vmatprep.subr.bf16.mxu1 %v5210_v55  ;;  %v2694_v8 = vld [vmem:[#allocation2 + $0x30] sm:$0xf]  ;;  %v2688_v44 = vld [vmem:[#allocation2 + $0x18] sm:$0xf]  ;;  %v3361_v46 = vshrl.u32 %v3344_v13, 16  ;;  %v3364_v20 = vshll.u32 %v3344_v13, 16 }
 0x181   : > { %v2708_v61 = vrot.slane %v2707_v50, 4  ;;  %v5230_v6 = vld [vmem:[#allocation3 + $0x140] sm:$0xff]   ;;  %v4368_v62 = vrot.slane %v2970_v3, 9  ;;  %v3011_v22 = vrot.slane %v6053_v21, 5  ;;  %v2743_v43 = vshrl.u32 %v2690_v17, 16 }
 0x182   : > { %4857 = vmatpush3.bf16.msra.mxu0 %v5211_v56  ;;  %v4326_v56 = vrot.slane %v2310_v39, 9  ;;  %v2692_v34 = vld [vmem:[#allocation2 + $0x28] sm:$0xf]  ;;  %v6065_v23 = vld [vmem:[#allocation2 + $0x38] sm:$0xe]  ;;  %v3378_v30 = vshll.u32 %v3346_v27, 16 }
 0x183   : > { %4827 = vmatpush3.bf16.msra.mxu1 %v5210_v55  ;;  %4890 = vmatprep.subr.bf16.mxu0 %v5214_v37  ;;  %v5224_v55 = vld [vmem:[#allocation3 + $0x158] sm:$0xff]   ;;  %v6071_v42 = vld [vmem:[#allocation2 + $0x3c] sm:$0x1]  ;;  %v2732_v47 = vshll.u32 %v2688_v44, 16  ;;  %v2972_v50 = vld [vmem:[#allocation2 + $0x40] sm:$0xe] }
 0x184   : > { %4828 = vmatprep.subr.bf16.mxu1 %v5212_v57  ;;  %v3380_v0 = vrot.slane %v3378_v30, 5  ;;  %v6082_v3 = vld [vmem:[#allocation2 + $0x1c] sm:$0x1]  ;;  %v3855_v45 = vld [vmem:[%s5565_s26 + $0xcc] sm:$0xf] }
 0x185   : > { %4859 = vmatmul.mubr.bf16.vlgmr.msra.gmra.mxu0 %v5213_v60  ;;  %v5225_v60 = vld [vmem:[#allocation3 + $0x128] sm:$0xff]   ;;  %v2734_v15 = vrot.slane %v2732_v47, 5 }
 0x186   : > { %4862 = vmatprep.mubr.bf16.mxu0 %v5216_v48  ;;  %4891 = vmatpush3.bf16.msra.mxu0 %v5214_v37  ;;  %v2710_v37 = vshll.u32 %v6013_v11, 16  ;;  %v2726_v48 = vrot.slane %v2724_v51, 5  ;;  %v3363_v51 = vrot.slane %v3361_v46, 4 }
 0x187   : > { %4829 = vmatpush3.bf16.msra.mxu1 %v5212_v57  ;;  %4892 = vmatprep.subr.bf16.mxu0 %v5217_v53  ;;  %v2360_v57 = vrot.slane %v5967_v40, 5 }
 0x188   : > { %4830 = vmatprep.subr.bf16.mxu1 %v5215_v58  ;;  %v2712_v9 = vrot.slane %v2710_v37, 5  ;;  %v3012_v37 = vsel %vm5999_vm11, %v4368_v62, %v3011_v22  ;;  %v3384_v22 = vshll.u32 %v6082_v3, 16 }
 0x189   : > { %v2361_v40 = vsel %vm5999_vm11, %v4326_v56, %v2360_v57  ;;  %v2760_v56 = vshll.u32 %v2692_v34, 16  ;;  %v5232_v57 = vld [vmem:[#allocation3 + $0x1f8] sm:$0xff]  }
 0x18a   : > { %4893 = vmatpush3.bf16.msra.mxu0 %v5217_v53  ;;  %v6041_v53 = vld [vmem:[#allocation2 + $0x24] sm:$0x1]  ;;  %v4330_v24 = vcombine.low %v2357_v19, %v2361_v40  ;;  %v2713_v54 = vsel %vm5921_vm8, %v2708_v61, %v2712_v9  ;;  %v2745_v19 = vrot.slane %v2743_v43, 4  ;;  %v2698_v9 = vld [vmem:[#allocation2 + $0x40] sm:$0xf] }
 0x18b   : > { %4831 = vmatpush3.bf16.msra.mxu1 %v5215_v58  ;;  %4894 = vmatprep.subr.bf16.mxu0 %v5220_v26  ;;  %v2722_v58 = vrot.slane %v2721_v35, 4  ;;  %v3003_v4 = vrot.slane %v6041_v53, 5  ;;  %v2774_v35 = vshll.u32 %v2694_v8, 16 }
 0x18c   : > { %4832 = vmatprep.subr.bf16.mxu1 %v5218_v16 }
 0x18d   : > { %4863 = vmatmul.mubr.bf16.gmra.mxu0 %v5219_v28  ;;  %v2727_v11 = vsel %vm5921_vm8, %v2722_v58, %v2726_v48  ;;  %v2746_v28 = vshll.u32 %v2690_v17, 16  ;;  %v6075_v58 = vld [vmem:[#allocation2 + $0x44] sm:$0x1]  ;;  %v2776_v40 = vrot.slane %v2774_v35, 5  ;;  %v2799_v17 = vshrl.u32 %v2698_v9, 16 }
 0x18e   : > { %4906 = vmatprep.mubr.bf16.mxu0 %v4371_v29  ;;  %4895 = vmatpush3.bf16.msra.mxu0 %v5220_v26  ;;  %v4351_v18 = vcombine.low %v2713_v54, %v2727_v11  ;;  %v3007_v26 = vrot.slane %v6047_v36, 5  ;;  %v3375_v29 = vshrl.u32 %v3346_v27, 16  ;;  %v3015_v11 = vrot.slane %v6071_v42, 5  ;;  %v6079_v54 = vld [vmem:[#allocation2 + $0x14] sm:$0x1] }
 0x18f   : > { %4833 = vmatpush3.bf16.msra.mxu1 %v5218_v16  ;;  %4896 = vmatprep.subr.bf16.mxu0 %v5222_v31  ;;  %v2969_v16 = vld [vmem:[#allocation2 + $0x28] sm:$0xe]  ;;  %v2748_v61 = vrot.slane %v2746_v28, 5  ;;  %v2738_v27 = vshll.u32 %v6037_v49, 16  ;;  %v2780_v28 = vshll.u32 %v6053_v21, 16 }
 0x190   : > { %4866 = vmatprep.subr.bf16.mxu1 %v5221_v41  ;;  %v4367_v7 = vrot.slane %v2969_v16, 9  ;;  %v3377_v48 = vrot.slane %v3375_v29, 4  ;;  %v2762_v16 = vrot.slane %v2760_v56, 5  ;;  %v2801_v29 = vrot.slane %v2799_v17, 4 }
 0x191   : > { %v2749_v13 = vor.u32 %v2748_v61, %v2745_v19  ;;  %v2782_v56 = vrot.slane %v2780_v28, 5 }
 0x192   : > { %4835 = vmatmul.mubr.bf16.vlgmr.msra.gmra.mxu1 %v4328_v25  ;;  %4897 = vmatpush3.bf16.msra.mxu0 %v5222_v31  ;;  %v2771_v31 = vshrl.u32 %v2694_v8, 16  ;;  %v5231_v25 = vld [vmem:[#allocation3 + $0x110] sm:$0xff]   ;;  %v3008_v1 = vsel %vm5999_vm11, %v4367_v7, %v3007_v26  ;;  %v2802_v7 = vshll.u32 %v2698_v9, 16  ;;  %v3370_v8 = vshll.u32 %v6079_v54, 16 }
 0x193   : > { %4838 = vmatprep.mubr.bf16.mxu1 %v4329_v52  ;;  %4867 = vmatpush3.bf16.msra.mxu1 %v5221_v41  ;;  %v6062_v41 = vsel %vm5999_vm11, %v4366_v2, %v3003_v4  ;;  %v3366_v52 = vrot.slane %v3364_v20, 5  ;;  %v4373_v14 = vcombine.low %v3008_v1, %v3012_v37  ;;  %v5234_v26 = vld [vmem:[#allocation3 + $0x1f0] sm:$0xff]   ;;  %v5235_v20 = vld [vmem:[#allocation3 + $0x100] sm:$0xff]  }
 0x194   : > { %4868 = vmatprep.subr.bf16.mxu1 %v5223_v32  ;;  %4898 = vmatprep.subr.bf16.mxu0 %v5224_v55  ;;  %v4372_v39 = vcombine.low %v6058_v10, %v6062_v41  ;;  %v2773_v5 = vrot.slane %v2771_v31, 4  ;;  %v2804_v30 = vrot.slane %v2802_v7, 5  ;;  %v3372_v31 = vrot.slane %v3370_v8, 5 }
 0x195   : > { %v3367_v2 = vor.u32 %v3366_v52, %v3363_v51  ;;  %v3386_v52 = vrot.slane %v3384_v22, 5 }
 0x196   : > { %4899 = vmatpush3.bf16.msra.mxu0 %v5224_v55  ;;  %v2757_v55 = vshrl.u32 %v2692_v34, 16  ;;  %v2777_v10 = vor.u32 %v2776_v40, %v2773_v5  ;;  %v2750_v34 = vrot.slane %v2749_v13, 4  ;;  %v2805_v19 = vor.u32 %v2804_v30, %v2801_v29  ;;  %v5238_v40 = vld [vmem:[#allocation3 + $0x1e0] sm:$0xff]  }
 0x197   : > { %4869 = vmatpush3.bf16.msra.mxu1 %v5223_v32  ;;  %4900 = vmatprep.subr.bf16.mxu0 %v5226_v59  ;;  %v2729_v32 = vshrl.u32 %v2688_v44, 16  ;;  %v2752_v44 = vshll.u32 %v6041_v53, 16  ;;  %v3368_v62 = vrot.slane %v3367_v2, 4  ;;  %v5236_v53 = vld [vmem:[#allocation3 + $0x1e8] sm:$0xff]   ;;  %v2794_v2 = vshll.u32 %v6071_v42, 16 }
 0x198   : > { %4870 = vmatprep.subr.bf16.mxu1 %v5225_v60  ;;  %v2759_v4 = vrot.slane %v2757_v55, 4 }
 0x199   : > { %v3373_v51 = vsel %vm5921_vm8, %v3368_v62, %v3372_v31  ;;  %v3358_v62 = vld [vmem:[#allocation2 + $0x48] sm:$0xf]  ;;  %v5242_v31 = vld [vmem:[#allocation2 + $0x10] ss:$8 sps:$4 sm:$0xff]  }
 0x19a   : > { %4839 = vmatmul.mubr.bf16.gmra.mxu1 %v4330_v24  ;;  %4901 = vmatpush3.bf16.msra.mxu0 %v5226_v59  ;;  %v4370_v59 = vrot.slane %v2972_v50, 9  ;;  %v2731_v24 = vrot.slane %v2729_v32, 4  ;;  %v2763_v43 = vor.u32 %v2762_v16, %v2759_v4  ;;  %v2754_v32 = vrot.slane %v2752_v44, 5  ;;  %v5237_v50 = vld [vmem:[#allocation3 + $0x1b8] sm:$0xff]   ;;  %v3352_v16 = vld [vmem:[#allocation2 + $0x30] sm:$0xf] }
 0x19b   : > { %4871 = vmatpush3.bf16.msra.mxu1 %v5225_v60  ;;  %4882 = vmatprep.mubr.bf16.mxu1 %v4351_v18  ;;  %v4369_v60 = vrot.slane %v6065_v23, 9  ;;  %v2696_v18 = vld [vmem:[#allocation2 + $0x38] sm:$0xf]  ;;  %v2806_v4 = vrot.slane %v2805_v19, 4  ;;  %v3417_v8 = vshrl.u32 %v3352_v16, 16 }
 0x19c   : > { %4872 = vmatprep.subr.bf16.mxu1 %v5227_v12  ;;  %4902 = vmatprep.subr.bf16.mxu0 %v5228_v63  ;;  %v2735_v41 = vor.u32 %v2734_v15, %v2731_v24  ;;  %v2788_v46 = vshll.u32 %v2696_v18, 16  ;;  %v2764_v55 = vrot.slane %v2763_v43, 4  ;;  %v2755_v37 = vsel %vm5921_vm8, %v2750_v34, %v2754_v32  ;;  %v5239_v15 = vld [vmem:[#allocation3 + $0x1b0] sm:$0xff]   ;;  %v5244_v34 = vld [vmem:[#allocation3 + $0x1a0] sm:$0xff]   ;;  %v6114_v32 = vld [vmem:[#allocation2 + $0x2c] sm:$0x1] }
 0x19d   : > { %v3419_v29 = vrot.slane %v3417_v8, 4 }
 0x19e   : > { %4903 = vmatpush3.bf16.msra.mxu0 %v5228_v63  ;;  %v3019_v63 = vrot.slane %v6075_v58, 5  ;;  %v2736_v1 = vrot.slane %v2735_v41, 4  ;;  %v2790_v21 = vrot.slane %v2788_v46, 5 }
 0x19f   : > { %4873 = vmatpush3.bf16.msra.mxu1 %v5227_v12  ;;  %4904 = vmatprep.subr.bf16.mxu0 %v5230_v6  ;;  %v5233_v12 = vld [vmem:[#allocation3 + $0x108] sm:$0xff]  }
 0x1a0   : > { %4874 = vmatprep.subr.bf16.mxu1 %v5229_v33  ;;  %v3020_v49 = vsel %vm5999_vm11, %v4370_v59, %v3019_v63  ;;  %v3348_v63 = vld [vmem:[#allocation2 + $0x20] sm:$0xf] }
 0x1a1   : > { %v3389_v41 = vshrl.u32 %v3348_v63, 16  ;;  %v3392_v44 = vshll.u32 %v3348_v63, 16 }
 0x1a2   : > { %4905 = vmatpush3.bf16.msra.mxu0 %v5230_v6  ;;  %v2785_v6 = vshrl.u32 %v2696_v18, 16  ;;  %v5240_v18 = vld [vmem:[#allocation3 + $0x1d8] sm:$0xff]  }
 0x1a3   : > { %4875 = vmatpush3.bf16.msra.mxu1 %v5229_v33  ;;  %4938 = vmatprep.subr.bf16.mxu0 %v5232_v57  ;;  %v3381_v33 = vor.u32 %v3380_v0, %v3377_v48 }
 0x1a4   : > { %4876 = vmatprep.subr.bf16.mxu1 %v5231_v25  ;;  %v2787_v47 = vrot.slane %v2785_v6, 4  ;;  %v5243_v6 = vld [vmem:[#allocation3 + $0x1d0] sm:$0xff]  }
 0x1a5   : > { %4907 = vmatmul.mubr.bf16.vlgmr.msra.gmra.mxu0 %v4372_v39  ;;  %v3382_v35 = vrot.slane %v3381_v33, 4  ;;  %v2778_v39 = vrot.slane %v2777_v10, 4  ;;  %v3420_v33 = vshll.u32 %v3352_v16, 16  ;;  %v2796_v10 = vrot.slane %v2794_v2, 5  ;;  %v6126_v16 = vld [vmem:[#allocation2 + $0x4c] sm:$0x1] }
 0x1a6   : > { %4910 = vmatprep.mubr.bf16.mxu0 %v4373_v14  ;;  %4939 = vmatpush3.bf16.msra.mxu0 %v5232_v57  ;;  %v2740_v57 = vrot.slane %v2738_v27, 5  ;;  %v2791_v9 = vor.u32 %v2790_v21, %v2787_v47  ;;  %v5241_v27 = vld [vmem:[#allocation3 + $0x1a8] sm:$0xff]   ;;  %v3468_v8 = vshll.u32 %v6126_v16, 16 }
 0x1a7   : > { %4877 = vmatpush3.bf16.msra.mxu1 %v5231_v25  ;;  %4940 = vmatprep.subr.bf16.mxu0 %v5234_v26  ;;  %v2766_v25 = vshll.u32 %v6047_v36, 16  ;;  %v3016_v36 = vsel %vm5999_vm11, %v4369_v60, %v3015_v11  ;;  %v3387_v48 = vsel %vm5921_vm8, %v3382_v35, %v3386_v52  ;;  %v2783_v5 = vsel %vm5921_vm8, %v2778_v39, %v2782_v56  ;;  %v6116_v52 = vld [vmem:[#allocation2 + $0x34] sm:$0x1] }
 0x1a8   : > { %4878 = vmatprep.subr.bf16.mxu1 %v5233_v12  ;;  %v4374_v61 = vcombine.low %v3016_v36, %v3020_v49  ;;  %v2741_v23 = vsel %vm5921_vm8, %v2736_v1, %v2740_v57  ;;  %v4395_v60 = vcombine.low %v3373_v51, %v3387_v48  ;;  %v2808_v11 = vshll.u32 %v6075_v58, 16  ;;  %v5245_v1 = vld [vmem:[#allocation3 + $0x1c8] sm:$0xff]   ;;  %v5246_v36 = vld [vmem:[#allocation3 + $0x198] sm:$0xff]   ;;  %v6118_v57 = vld [vmem:[#allocation2 + $0x24] sm:$0x1] }
 0x1a9   : > { %v2768_v0 = vrot.slane %v2766_v25, 5  ;;  %v4352_v59 = vcombine.low %v2741_v23, %v2755_v37  ;;  %v2792_v58 = vrot.slane %v2791_v9, 4  ;;  %v3422_v30 = vrot.slane %v3420_v33, 5  ;;  %v6121_v48 = vld [vmem:[#allocation2 + $0x3c] sm:$0x1] }
 0x1aa   : > { %4941 = vmatpush3.bf16.msra.mxu0 %v5234_v26  ;;  %v2810_v13 = vrot.slane %v2808_v11, 5  ;;  %v3354_v26 = vld [vmem:[#allocation2 + $0x38] sm:$0xf]  ;;  %v3391_v35 = vrot.slane %v3389_v41, 4  ;;  %v3394_v25 = vrot.slane %v3392_v44, 5  ;;  %v3459_v39 = vshrl.u32 %v3358_v62, 16 }
 0x1ab   : > { %4879 = vmatpush3.bf16.msra.mxu1 %v5233_v12  ;;  %4942 = vmatprep.subr.bf16.mxu0 %v5236_v53  ;;  %v2769_v24 = vsel %vm5921_vm8, %v2764_v55, %v2768_v0  ;;  %v3350_v12 = vld [vmem:[#allocation2 + $0x28] sm:$0xf]  ;;  %v3431_v46 = vshrl.u32 %v3354_v26, 16  ;;  %v2797_v22 = vsel %vm5921_vm8, %v2792_v58, %v2796_v10  ;;  %v3423_v37 = vor.u32 %v3422_v30, %v3419_v29  ;;  %v5247_v0 = vld [vmem:[#allocation3 + $0x1c0] sm:$0xff]   ;;  %v6128_v58 = vld [vmem:[#allocation2 + $0x44] sm:$0x1] }
 0x1ac   : > { %4880 = vmatprep.subr.bf16.mxu1 %v5235_v20  ;;  %v4353_v14 = vcombine.low %v2769_v24, %v2783_v5  ;;  %v3403_v17 = vshrl.u32 %v3350_v12, 16  ;;  %v3406_v7 = vshll.u32 %v3350_v12, 16  ;;  %v2811_v42 = vsel %vm5921_vm8, %v2806_v4, %v2810_v13  ;;  %v5249_v33 = vld [vmem:[#allocation3 + $0x188] sm:$0xff]   ;;  %v6156_v29 = vld [vmem:[%s6414_s5 + $0x28] sm:$0xff]  }
 0x1ad   : > { %4911 = vmatmul.mubr.bf16.gmra.mxu0 %v4374_v61  ;;  %v4354_v49 = vcombine.low %v2797_v22, %v2811_v42  ;;  %v3433_v47 = vrot.slane %v3431_v46, 4  ;;  %v3395_v19 = vor.u32 %v3394_v25, %v3391_v35  ;;  %v3412_v61 = vshll.u32 %v6114_v32, 16  ;;  %v3849_v30 = vld [vmem:[%s5565_s26 + $0xc] sm:$0xf] }
 0x1ae   : > { %4943 = vmatpush3.bf16.msra.mxu0 %v5236_v53  ;;  %4954 = vmatprep.mubr.bf16.mxu0 %v4395_v60  ;;  %v3405_v43 = vrot.slane %v3403_v17, 4  ;;  %v3408_v28 = vrot.slane %v3406_v7, 5  ;;  %v3356_v53 = vld [vmem:[#allocation2 + $0x40] sm:$0xf]  ;;  %v3426_v5 = vshll.u32 %v6116_v52, 16  ;;  %v3461_v23 = vrot.slane %v3459_v39, 4 }
 0x1af   : > { %4881 = vmatpush3.bf16.msra.mxu1 %v5235_v20  ;;  %4944 = vmatprep.subr.bf16.mxu0 %v5238_v40  ;;  %v3434_v20 = vshll.u32 %v3354_v26, 16  ;;  %v3445_v55 = vshrl.u32 %v3356_v53, 16  ;;  %v3448_v56 = vshll.u32 %v3356_v53, 16  ;;  %v3398_v9 = vshll.u32 %v6118_v57, 16  ;;  %v6133_v17 = vld [vmem:[%s6414_s5 + $0x38] sm:$0xff]   ;;  %v5252_v25 = vld [vmem:[#allocation3 + $0x238] sm:$0xff]  }
 0x1b0   : > { %4914 = vmatprep.subr.bf16.mxu1 %v5237_v50  ;;  %v3409_v51 = vor.u32 %v3408_v28, %v3405_v43  ;;  %v3424_v12 = vrot.slane %v3423_v37, 4  ;;  %v3396_v2 = vrot.slane %v3395_v19, 4  ;;  %v3414_v4 = vrot.slane %v3412_v61, 5  ;;  %v3850_v53 = vld [vmem:[%s5565_s26 + $0x2c] sm:$0xf]  ;;  %v6177_v37 = vld [vmem:[%s6414_s5 + $0x18] sm:$0xff]  }
 0x1b1   : > { %v3436_v21 = vrot.slane %v3434_v20, 5  ;;  %v3450_v24 = vrot.slane %v3448_v56, 5  ;;  %v3400_v7 = vrot.slane %v3398_v9, 5  ;;  %v3454_v44 = vshll.u32 %v6128_v58, 16  ;;  %v6149_v20 = vld [vmem:[%s6414_s5 + $0x30] sm:$0xff]   ;;  %v5257_v19 = vld [vmem:[#allocation3 + $0x228] sm:$0xff]  }
 0x1b2   : > { %4883 = vmatmul.mubr.bf16.vlgmr.msra.gmra.mxu1 %v4352_v59  ;;  %4945 = vmatpush3.bf16.msra.mxu0 %v5238_v40  ;;  %v3410_v11 = vrot.slane %v3409_v51, 4  ;;  %v3447_v59 = vrot.slane %v3445_v55, 4  ;;  %v3470_v28 = vrot.slane %v3468_v8, 5  ;;  %v4428_v39 = vcombine.low %v3849_v30, %v3850_v53  ;;  %v5253_v51 = vld [vmem:[#allocation2 + $0x30] ss:$8 sps:$4 sm:$0xff]   ;;  %v6196_v9 = vld [vmem:[%s6414_s5 + $0x8] sm:$0xff]  }
 0x1b3   : > { %4886 = vmatprep.mubr.bf16.mxu1 %v4353_v14  ;;  %4915 = vmatpush3.bf16.msra.mxu1 %v5237_v50  ;;  %v3462_v50 = vshll.u32 %v3358_v62, 16  ;;  %v3437_v40 = vor.u32 %v3436_v21, %v3433_v47  ;;  %v3440_v14 = vshll.u32 %v6121_v48, 16  ;;  %v3401_v41 = vsel %vm5921_vm8, %v3396_v2, %v3400_v7  ;;  %v6169_v47 = vld [vmem:[%s6414_s5 + $0x20] sm:$0xff]   ;;  %v3625_v21 = vld [vmem:[#allocation2 + $0x10] sm:$0xe] }
 0x1b4   : > { %4916 = vmatprep.subr.bf16.mxu1 %v5239_v15  ;;  %4946 = vmatprep.subr.bf16.mxu0 %v5240_v18  ;;  %v3415_v26 = vsel %vm5921_vm8, %v3410_v11, %v3414_v4  ;;  %v3626_v55 = vld [vmem:[#allocation2 + $0x18] sm:$0xe]  ;;  %v4407_v56 = vrot.slane %v3625_v21, 9  ;;  %v5261_v11 = vld [vmem:[#allocation3 + $0x218] sm:$0xff]  }
 0x1b5   : > { %v3464_v60 = vrot.slane %v3462_v50, 5  ;;  %v3438_v63 = vrot.slane %v3437_v40, 4  ;;  %v3442_v42 = vrot.slane %v3440_v14, 5  ;;  %v5251_v50 = vld [vmem:[#allocation2 + $0x20] ss:$8 sps:$4 sm:$0xff]   ;;  %v4408_v61 = vrot.slane %v3626_v55, 9 }
 0x1b6   : > { %4947 = vmatpush3.bf16.msra.mxu0 %v5240_v18  ;;  %v3428_v18 = vrot.slane %v3426_v5, 5  ;;  %v5256_v40 = vld [vmem:[#allocation2 + $0x40] ss:$8 sps:$4 sm:$0xff]   ;;  %v5265_v14 = vld [vmem:[#allocation3 + $0x208] sm:$0xff]   ;;  %v3853_v30 = vld [vmem:[%s5565_s26 + $0x8c] sm:$0xf] }
 0x1b7   : > { %4917 = vmatpush3.bf16.msra.mxu1 %v5239_v15  ;;  %4948 = vmatprep.subr.bf16.mxu0 %v5243_v6  ;;  %v5248_v15 = vld [vmem:[#allocation3 + $0x190] sm:$0xff]   ;;  %v3465_v13 = vor.u32 %v3464_v60, %v3461_v23  ;;  %v3443_v46 = vsel %vm5921_vm8, %v3438_v63, %v3442_v42  ;;  %v5259_v60 = vld [vmem:[#allocation3 + $0x220] sm:$0xff]   ;;  %v3628_v4 = vld [vmem:[#allocation2 + $0x28] sm:$0xe]  ;;  %v3659_v42 = vrot.slane %v6118_v57, 5 }
 0x1b8   : > { %4918 = vmatprep.subr.bf16.mxu1 %v5241_v27  ;;  %v3429_v10 = vsel %vm5921_vm8, %v3424_v12, %v3428_v18  ;;  %v3852_v12 = vld [vmem:[%s5565_s26 + $0x6c] sm:$0xf]  ;;  %v3629_v18 = vld [vmem:[#allocation2 + $0x30] sm:$0xe]  ;;  %v4410_v7 = vrot.slane %v3628_v4, 9 }
 0x1b9   : > { %v4397_v62 = vcombine.low %v3429_v10, %v3443_v46  ;;  %v3466_v43 = vrot.slane %v3465_v13, 4  ;;  %v5267_v63 = vld [vmem:[#allocation3 + $0x200] sm:$0xff]   ;;  %v3627_v13 = vld [vmem:[#allocation2 + $0x20] sm:$0xe]  ;;  %v4411_v8 = vrot.slane %v3629_v18, 9 }
 0x1ba   : > { %4887 = vmatmul.mubr.bf16.gmra.mxu1 %v4354_v49  ;;  %4949 = vmatpush3.bf16.msra.mxu0 %v5243_v6  ;;  %v4396_v6 = vcombine.low %v3401_v41, %v3415_v26  ;;  %v5250_v49 = vld [vmem:[#allocation3 + $0x180] sm:$0xff]   ;;  %v3663_v26 = vrot.slane %v6114_v32, 5  ;;  %v4409_v10 = vrot.slane %v3627_v13, 9  ;;  %v3632_v46 = vld [vmem:[#allocation2 + $0x48] sm:$0xe] }
 0x1bb   : > { %4919 = vmatpush3.bf16.msra.mxu1 %v5241_v27  ;;  %4930 = vmatprep.mubr.bf16.mxu1 %v5242_v31  ;;  %v3451_v27 = vor.u32 %v3450_v24, %v3447_v59  ;;  %v3471_v35 = vsel %vm5921_vm8, %v3466_v43, %v3470_v28  ;;  %v6203_v59 = vld [vmem:[%s6414_s5] sm:$0xff]   ;;  %v3854_v53 = vld [vmem:[%s5565_s26 + $0xac] sm:$0xf] }
 0x1bc   : > { %4920 = vmatprep.subr.bf16.mxu1 %v5244_v34  ;;  %4950 = vmatprep.subr.bf16.mxu0 %v5245_v1  ;;  %v5263_v24 = vld [vmem:[#allocation3 + $0x210] sm:$0xff]  }
 0x1bd   : > { %v3452_v22 = vrot.slane %v3451_v27, 4  ;;  %v3630_v27 = vld [vmem:[#allocation2 + $0x38] sm:$0xe]  ;;  %v3631_v32 = vld [vmem:[#allocation2 + $0x40] sm:$0xe] }
 0x1be   : > { %4951 = vmatpush3.bf16.msra.mxu0 %v5245_v1  ;;  %v4412_v41 = vrot.slane %v3630_v27, 9  ;;  %v4413_v28 = vrot.slane %v3631_v32, 9 }
 0x1bf   : > { %4921 = vmatpush3.bf16.msra.mxu1 %v5244_v34  ;;  %4952 = vmatprep.subr.bf16.mxu0 %v5247_v0  ;;  %v3456_v34 = vrot.slane %v3454_v44, 5  ;;  %v3671_v44 = vrot.slane %v6121_v48, 5  ;;  %v4414_v48 = vrot.slane %v3632_v46, 9 }
 0x1c0   : > { %4922 = vmatprep.subr.bf16.mxu1 %v5246_v36 }
 0x1c1   : > { %v3457_v31 = vsel %vm5921_vm8, %v3452_v22, %v3456_v34  ;;  %v3672_v57 = vsel %vm5999_vm11, %v4412_v41, %v3671_v44  ;;  %v3679_v34 = vrot.slane %v6126_v16, 5 }
 0x1c2   : > { %4953 = vmatpush3.bf16.msra.mxu0 %v5247_v0  ;;  %v4398_v1 = vcombine.low %v3457_v31, %v3471_v35  ;;  %v3655_v0 = vrot.slane %v6082_v3, 5 }
 0x1c3   : > { %4923 = vmatpush3.bf16.msra.mxu1 %v5246_v36  ;;  %4986 = vmatprep.subr.bf16.mxu0 %v6133_v17  ;;  %v3651_v36 = vrot.slane %v6079_v54, 5  ;;  %v6187_v54 = vld [vmem:[%s6414_s5 + $0x10] sm:$0xff]   ;;  %v3680_v35 = vsel %vm5999_vm11, %v4414_v48, %v3679_v34 }
 0x1c4   : > { %4924 = vmatprep.subr.bf16.mxu1 %v5248_v15  ;;  %v3656_v23 = vsel %vm5999_vm11, %v4408_v61, %v3655_v0 }
 0x1c5   : > { %4955 = vmatmul.mubr.bf16.vlgmr.msra.gmra.mxu0 %v4396_v6  ;;  %v3652_v5 = vsel %vm5999_vm11, %v4407_v56, %v3651_v36  ;;  %v3664_v6 = vsel %vm5999_vm11, %v4410_v7, %v3663_v26 }
 0x1c6   : > { %4958 = vmatprep.mubr.bf16.mxu0 %v4397_v62  ;;  %4987 = vmatpush3.bf16.msra.mxu0 %v6133_v17  ;;  %v4415_v3 = vcombine.low %v3652_v5, %v3656_v23 }
 0x1c7   : > { %4925 = vmatpush3.bf16.msra.mxu1 %v5248_v15  ;;  %4988 = vmatprep.subr.bf16.mxu0 %v6149_v20  ;;  %v3851_v15 = vld [vmem:[%s5565_s26 + $0x4c] sm:$0xf] }
 0x1c8   : > { %4926 = vmatprep.subr.bf16.mxu1 %v5249_v33  ;;  %v4429_v2 = vcombine.low %v3851_v15, %v3852_v12 }
 0x1ca   : > { %4989 = vmatpush3.bf16.msra.mxu0 %v6149_v20 }
 0x1cb   : > { %4927 = vmatpush3.bf16.msra.mxu1 %v5249_v33  ;;  %4990 = vmatprep.subr.bf16.mxu0 %v6156_v29  ;;  %v3667_v33 = vrot.slane %v6116_v52, 5  ;;  %v3660_v52 = vsel %vm5999_vm11, %v4409_v10, %v3659_v42 }
 0x1cc   : > { %4928 = vmatprep.subr.bf16.mxu1 %v5250_v49  ;;  %v4416_v22 = vcombine.low %v3660_v52, %v3664_v6 }
 0x1cd   : > { %4959 = vmatmul.mubr.bf16.gmra.mxu0 %v4398_v1  ;;  %v3668_v62 = vsel %vm5999_vm11, %v4411_v8, %v3667_v33 }
 0x1ce   : > { %4991 = vmatpush3.bf16.msra.mxu0 %v6156_v29  ;;  %5002 = vmatprep.mubr.bf16.mxu0 %v4428_v39  ;;  %v4417_v43 = vcombine.low %v3668_v62, %v3672_v57 }
 0x1cf   : > { %4929 = vmatpush3.bf16.msra.mxu1 %v5250_v49  ;;  %4992 = vmatprep.subr.bf16.mxu0 %v6169_v47  ;;  %v3675_v49 = vrot.slane %v6128_v58, 5  ;;  %v4430_v58 = vcombine.low %v3853_v30, %v3854_v53 }
 0x1d0   : > { %4962 = vmatprep.subr.bf16.mxu1 %v5252_v25 }
 0x1d1   : > { %v3676_v31 = vsel %vm5999_vm11, %v4413_v28, %v3675_v49 }
 0x1d2   : > { %4931 = vmatmul.mubr.bf16.vlgmr.msra.gmra.mxu1 %v5251_v50  ;;  %4993 = vmatpush3.bf16.msra.mxu0 %v6169_v47  ;;  %v4418_v16 = vcombine.low %v3676_v31, %v3680_v35 }
 0x1d3   : > { %4934 = vmatprep.mubr.bf16.mxu1 %v5253_v51  ;;  %4963 = vmatpush3.bf16.msra.mxu1 %v5252_v25 }
 0x1d4   : > { %4964 = vmatprep.subr.bf16.mxu1 %v5254_v38  ;;  %4994 = vmatprep.subr.bf16.mxu0 %v6177_v37 }
 0x1d6   : > { %4995 = vmatpush3.bf16.msra.mxu0 %v6177_v37 }
 0x1d7   : > { %4965 = vmatpush3.bf16.msra.mxu1 %v5254_v38  ;;  %4996 = vmatprep.subr.bf16.mxu0 %v6187_v54 }
 0x1d8   : > { %4966 = vmatprep.subr.bf16.mxu1 %v5257_v19 }
 0x1da   : > { %4935 = vmatmul.mubr.bf16.gmra.mxu1 %v5256_v40  ;;  %4997 = vmatpush3.bf16.msra.mxu0 %v6187_v54 }
 0x1db   : > { %4967 = vmatpush3.bf16.msra.mxu1 %v5257_v19  ;;  %4978 = vmatprep.mubr.bf16.mxu1 %v4415_v3 }
 0x1dc   : > { %4968 = vmatprep.subr.bf16.mxu1 %v5259_v60  ;;  %4998 = vmatprep.subr.bf16.mxu0 %v6196_v9 }
 0x1de   : > { %4999 = vmatpush3.bf16.msra.mxu0 %v6196_v9 }
 0x1df   : > { %4969 = vmatpush3.bf16.msra.mxu1 %v5259_v60  ;;  %5000 = vmatprep.subr.bf16.mxu0 %v6203_v59 }
 0x1e0   : > { %4970 = vmatprep.subr.bf16.mxu1 %v5261_v11 }
 0x1e2   : > { %5001 = vmatpush3.bf16.msra.mxu0 %v6203_v59 }
 0x1e3   : > { %4971 = vmatpush3.bf16.msra.mxu1 %v5261_v11 }
 0x1e4   : > { %4972 = vmatprep.subr.bf16.mxu1 %v5263_v24 }
 0x1e5   : > { %5003 = vmatmul.mubr.bf16.vlgmr.msra.gmra.mxu0 %v4429_v2 }
 0x1e7   : > { %4973 = vmatpush3.bf16.msra.mxu1 %v5263_v24 }
 0x1e8   : > { %4974 = vmatprep.subr.bf16.mxu1 %v5265_v14 }
 0x1eb   : > { %4975 = vmatpush3.bf16.msra.mxu1 %v5265_v14 }
 0x1ec   : > { %4976 = vmatprep.subr.bf16.mxu1 %v5267_v63 }
 0x1ef   : > { %4977 = vmatpush3.bf16.msra.mxu1 %v5267_v63 }
 0x1f0   : > { %5010 = vmatprep.subr.bf16.mxu1 %v6133_v17 }
 0x1f2   : > { %4979 = vmatmul.mubr.bf16.vlgmr.msra.gmra.mxu1 %v4416_v22 }
 0x1f3   : > { %4982 = vmatprep.mubr.bf16.mxu1 %v4417_v43  ;;  %5018 = vmatpush3.bf16.msra.mxu1 %v6133_v17  ;;  %v3856_v17 = vld [vmem:[%s5565_s26 + $0xec] sm:$0xf]  ;;  %s257_s26 = sand.u32 1, %s5352_s22  }
 0x1f4   : > { %5011 = vmatprep.subr.bf16.mxu1 %v6149_v20  ;;  %s4128_s13 = sshll.u32 %s257_s26, 6  ;;  %s6369_s20 = scalar_lea.sflag [#allocation5], %s257_s26 }
 0x1f5   : > { %s6318_s14 = scalar_lea.vmem [#allocation6], %s4128_s13 }
 0x1f6   : > { %s4048_s15 = sshll.u32 %s6318_s14, 4  ;;  %s6358_s15 = int_to_ptr.vmem [resolvable:$true] %s4048_s15 }
 0x1f7   : > { %5019 = vmatpush3.bf16.msra.mxu1 %v6149_v20  ;;  %v4431_v20 = vcombine.low %v3855_v45, %v3856_v17  ;;  %s5296_s25 = scalar_lea.vmem %s6358_s15, 1024  ;;  %p5303_p11 = scmp.lt.s32.totalorder %s6358_s15, %s5301_s29 }
 0x1f8   : > { %5012 = vmatprep.subr.bf16.mxu1 %v6156_v29  ;;  %p5297_p8 = scmp.ne.s32.totalorder %s6358_s15, %s5296_s25  ;;  %p5304_p12 = scmp.lt.s32.totalorder %s5302_s9, %s5296_s25 }
 0x1fa   : > { %4983 = vmatmul.mubr.bf16.gmra.mxu1 %v4418_v16  ;;  %p5298_p9 = pnand %p5297_p8, %p5442_p5  ;;  %p5305_p13 = por %p5304_p12, %p5303_p11 }
 0x1fb   : > { %5020 = vmatpush3.bf16.msra.mxu1 %v6156_v29  ;;  %5006 = vmatprep.mubr.bf16.mxu1 %v4430_v58 }
 0x1fc   : > { %5013 = vmatprep.subr.bf16.mxu1 %v6169_v47  ;;  %p5299_p10 = pneg %p5298_p9 }
 0x1fe   : > { %p5306_p0 = pnand %p5305_p13, %p5299_p10 }
 0x1ff   : > { %5021 = vmatpush3.bf16.msra.mxu1 %v6169_v47 }
 0x200   : > { %5014 = vmatprep.subr.bf16.mxu1 %v6177_v37 }
 0x203   : > { %5022 = vmatpush3.bf16.msra.mxu1 %v6177_v37 }
 0x204   : > { %5015 = vmatprep.subr.bf16.mxu1 %v6187_v54 }
 0x207   : > { %5023 = vmatpush3.bf16.msra.mxu1 %v6187_v54 }
 0x208   : > { %5016 = vmatprep.subr.bf16.mxu1 %v6196_v9 }
 0x20b   : > { %5024 = vmatpush3.bf16.msra.mxu1 %v6196_v9 }
 0x20c   : > { %5017 = vmatprep.subr.bf16.mxu1 %v6203_v59 }
 0x20f   : > { %5025 = vmatpush3.bf16.msra.mxu1 %v6203_v59 }
 0x212   : > { %5007 = vmatmul.mubr.bf16.vlgmr.msra.gmra.mxu1 %v4431_v20 }
 0x225   : > { %v4812_v29 = vpop.f32.mrf.mxu0 }
 0x227   : > { %v2272_v25 = vpop.f32.mrf.mxu0 }
 0x229   : > { %v4813_v39 = vpop.f32.mrf.mxu0 }
 0x22b   : > { %v6248_v1 = vpop.f32.mrf.mxu0 }
 0x230   : > { %v4816_v21 = vpop.f32.mrf.mxu0 }
 0x232   : > { %v4788_v47 = vpop.f32.mrf.mxu1  ;;  %v2288_v51 = vpop.f32.mrf.mxu0 }
 0x233   : > { %v2281_v58 = vadd.f32 %v4812_v29, %v4788_v47 }
 0x234   : > { %v2135_v50 = vpop.f32.mrf.mxu1  ;;  %v4817_v37 = vpop.f32.mrf.mxu0 }
 0x235   : > { %v2273_v17 = vadd.f32 %v2272_v25, %v2135_v50 }
 0x236   : > { %v4789_v38 = vpop.f32.mrf.mxu1  ;;  %v2291_v54 = vpop.f32.mrf.mxu0 }
 0x238   : > { %v2138_v55 = vpop.f32.mrf.mxu1 }
 0x23a   : > { %v4792_v56 = vpop.f32.mrf.mxu1 }
 0x23b   : > { %v6250_v36 = vadd.f32 %v4816_v21, %v4792_v56  ;;  %v2284_v21 = vadd.f32 %v4813_v39, %v4789_v38 }
 0x23c   : > { %v2151_v19 = vpop.f32.mrf.mxu1 }
 0x23d   : > { %v6252_v61 = vadd.f32 %v2288_v51, %v2151_v19  ;;  %v2276_v19 = vadd.f32 %v6248_v1, %v2138_v55 }
 0x23e   : > { %v4793_v0 = vpop.f32.mrf.mxu1 }
 0x23f   : > { %v6254_v5 = vadd.f32 %v4817_v37, %v4793_v0 }
 0x240   : > { %v2154_v40 = vpop.f32.mrf.mxu1 }
 0x241   : > { %v6256_v23 = vadd.f32 %v2291_v54, %v2154_v40 }
 0x245   : > { %v4860_v60 = vpop.f32.mrf.mxu0 }
 0x247   : > { %v2645_v3 = vpop.f32.mrf.mxu0 }
 0x249   : > { %v4861_v11 = vpop.f32.mrf.mxu0 }
 0x24b   : > { %v2648_v24 = vpop.f32.mrf.mxu0 }
 0x24d   : > { %v6258_v12 = vpop.f32.mrf.mxu0 }
 0x24f   : > { %v6260_v2 = vpop.f32.mrf.mxu0 }
 0x251   : > { %v6264_v18 = vpop.f32.mrf.mxu0 }
 0x252   : > { %v4836_v9 = vpop.f32.mrf.mxu1 }
 0x253   : > { %v6268_v13 = vpop.f32.mrf.mxu0  ;;  %v2509_v20 = vadd.f32 %v4836_v9, %v2281_v58 }
 0x254   : > { %v2476_v59 = vpop.f32.mrf.mxu1 }
 0x255   : > { %v2507_v51 = vadd.f32 %v2476_v59, %v2273_v17  ;;  %v2678_v54 = vadd.f32 %v4860_v60, %v2509_v20 }
 0x256   : > { %v4837_v15 = vpop.f32.mrf.mxu1 }
 0x257   : > { %v2510_v0 = vadd.f32 %v4837_v15, %v2284_v21 }
 0x258   : > { %v2479_v14 = vpop.f32.mrf.mxu1 }
 0x259   : > { %v2508_v40 = vadd.f32 %v2479_v14, %v2276_v19  ;;  %v2679_v25 = vadd.f32 %v4861_v11, %v2510_v0 }
 0x25a   : > { %v6262_v4 = vpop.f32.mrf.mxu1 }
 0x25b   : > { %v2677_v39 = vadd.f32 %v2648_v24, %v2508_v40  ;;  %v6309_v24 = vld [vmem:[%s6413_s4] ss:$0 sm:$0xff] }
 0x25c   : > { %v6266_v63 = vpop.f32.mrf.mxu1 }
 0x25e   : > { %v6270_v7 = vpop.f32.mrf.mxu1 }
 0x260   : > { %v6272_v27 = vpop.f32.mrf.mxu1 }
 0x265   : > { %v4908_v26 = vpop.f32.mrf.mxu0 }
 0x267   : > { %v3135_v8 = vpop.f32.mrf.mxu0 }
 0x269   : > { %v4909_v10 = vpop.f32.mrf.mxu0 }
 0x26b   : > { %v3138_v41 = vpop.f32.mrf.mxu0 }
 0x26d   : > { %v6274_v6 = vpop.f32.mrf.mxu0 }
 0x26f   : > { %v6276_v62 = vpop.f32.mrf.mxu0 }
 0x270   : > { %6446 = vst [vmem:[#allocation12_spill] sm:$0xff] %v6276_v62 }
 0x271   : > { %v6280_v52 = vpop.f32.mrf.mxu0 }
 0x272   : > { %v4884_v33 = vpop.f32.mrf.mxu1  ;;  %6447 = vst [vmem:[#allocation11_spill] sm:$0xff] %v6280_v52  ;;  %v2676_v52 = vadd.f32 %v2645_v3, %v2507_v51 }
 0x273   : > { %v6284_v57 = vpop.f32.mrf.mxu0 }
 0x274   : > { %v2926_v42 = vpop.f32.mrf.mxu1  ;;  %6448 = vst [vmem:[#allocation13_spill] sm:$0xff] %v6284_v57  ;;  %v2959_v57 = vadd.f32 %v4884_v33, %v2678_v54 }
 0x275   : > { %v2957_v47 = vadd.f32 %v2926_v42, %v2676_v52 }
 0x276   : > { %v4885_v44 = vpop.f32.mrf.mxu1  ;;  %v3168_v38 = vadd.f32 %v4908_v26, %v2959_v57 }
 0x277   : > { %v2960_v50 = vadd.f32 %v4885_v44, %v2679_v25  ;;  %v3166_v60 = vadd.f32 %v3135_v8, %v2957_v47  ;;  %v2511_v25 = vadd.f32 %v6266_v63, %v6252_v61 }
 0x278   : > { %v2929_v46 = vpop.f32.mrf.mxu1 }
 0x279   : > { %v2958_v1 = vadd.f32 %v2929_v46, %v2677_v39  ;;  %v3169_v3 = vadd.f32 %v4909_v10, %v2960_v50 }
 0x27a   : > { %v6278_v32 = vpop.f32.mrf.mxu1 }
 0x27b   : > { %v3167_v17 = vadd.f32 %v3138_v41, %v2958_v1  ;;  %v2512_v1 = vadd.f32 %v6272_v27, %v6256_v23  ;;  %v6449_v27 = vld [vmem:[#allocation12_spill] sm:$0xff] }
 0x27c   : > { %v6282_v22 = vpop.f32.mrf.mxu1 }
 0x27e   : > { %v6286_v48 = vpop.f32.mrf.mxu1 }
 0x280   : > { %v6288_v28 = vpop.f32.mrf.mxu1 }
 0x285   : > { %v4956_v43 = vpop.f32.mrf.mxu0 }
 0x287   : > { %v3586_v49 = vpop.f32.mrf.mxu0 }
 0x289   : > { %v4957_v30 = vpop.f32.mrf.mxu0 }
 0x28b   : > { %v3589_v31 = vpop.f32.mrf.mxu0 }
 0x28d   : > { %v6290_v16 = vpop.f32.mrf.mxu0 }
 0x28f   : > { %v6292_v56 = vpop.f32.mrf.mxu0 }
 0x291   : > { %v6297_v62 = vpop.f32.mrf.mxu0 }
 0x292   : > { %v4932_v34 = vpop.f32.mrf.mxu1 }
 0x293   : > { %v6301_v9 = vpop.f32.mrf.mxu0  ;;  %v3338_v55 = vadd.f32 %v4932_v34, %v3168_v38 }
 0x294   : > { %v3305_v53 = vpop.f32.mrf.mxu1 }
 0x295   : > { %v3336_v14 = vadd.f32 %v3305_v53, %v3166_v60  ;;  %v3619_v42 = vadd.f32 %v4956_v43, %v3338_v55  ;;  %v2680_v60 = vadd.f32 %v6260_v2, %v2511_v25 }
 0x296   : > { %v4933_v35 = vpop.f32.mrf.mxu1 }
 0x297   : > { %v3339_v58 = vadd.f32 %v4933_v35, %v3169_v3  ;;  %v3617_v52 = vadd.f32 %v3586_v49, %v3336_v14  ;;  %v2961_v61 = vadd.f32 %v6282_v22, %v2680_v60 }
 0x298   : > { %v3308_v45 = vpop.f32.mrf.mxu1 }
 0x299   : > { %v3337_v44 = vadd.f32 %v3308_v45, %v3167_v17  ;;  %v3620_v34 = vadd.f32 %v4957_v30, %v3339_v58  ;;  %v2513_v30 = vadd.f32 %v6262_v4, %v6250_v36  ;;  %v2514_v36 = vadd.f32 %v6270_v7, %v6254_v5  ;;  %v6450_v58 = vld [vmem:[#allocation11_spill] sm:$0xff]  ;;  %v6451_v17 = vld [vmem:[#allocation13_spill] sm:$0xff] }
 0x29a   : > { %v6294_v37 = vpop.f32.mrf.mxu1  ;;  %v2681_v5 = vadd.f32 %v6268_v13, %v2512_v1 }
 0x29b   : > { %v3618_v20 = vadd.f32 %v3589_v31, %v3337_v44  ;;  %v2682_v4 = vadd.f32 %v6258_v12, %v2513_v30  ;;  %v2683_v63 = vadd.f32 %v6264_v18, %v2514_v36 }
 0x29c   : > { %v6299_v29 = vpop.f32.mrf.mxu1  ;;  %v2962_v7 = vadd.f32 %v6288_v28, %v2681_v5 }
 0x29d   : > { %v2963_v55 = vadd.f32 %v6278_v32, %v2682_v4  ;;  %v2964_v14 = vadd.f32 %v6286_v48, %v2683_v63  ;;  %v3170_v32 = vadd.f32 %v6449_v27, %v2961_v61 }
 0x29e   : > { %v6303_v59 = vpop.f32.mrf.mxu1 }
 0x29f   : > { %v3172_v12 = vadd.f32 %v6274_v6, %v2963_v55  ;;  %v3340_v2 = vadd.f32 %v6299_v29, %v3170_v32  ;;  %v3173_v22 = vadd.f32 %v6450_v58, %v2964_v14 }
 0x2a0   : > { %v3324_v33 = vpop.f32.mrf.mxu1 }
 0x2a1   : > { %v3342_v23 = vadd.f32 %v6294_v37, %v3172_v12  ;;  %v3343_v18 = vadd.f32 %v6303_v59, %v3173_v22  ;;  %v3621_v28 = vadd.f32 %v6292_v56, %v3340_v2 }
 0x2a3   : > { %v3623_v48 = vadd.f32 %v6290_v16, %v3342_v23 }
 0x2a5   : > { %v5004_v15 = vpop.f32.mrf.mxu0 }
 0x2a7   : > { %v3979_v26 = vpop.f32.mrf.mxu0 }
 0x2a9   : > { %v5005_v43 = vpop.f32.mrf.mxu0 }
 0x2ab   : > { %v3982_v54 = vpop.f32.mrf.mxu0 }
 0x2b2   : > { %v4980_v11 = vpop.f32.mrf.mxu1 }
 0x2b3   : > { %v3828_v46 = vadd.f32 %v4980_v11, %v3619_v42  ;;  %v3171_v42 = vadd.f32 %v6451_v17, %v2962_v7 }
 0x2b4   : > { %v3795_v8 = vpop.f32.mrf.mxu1 }
 0x2b5   : > { %v3826_v57 = vadd.f32 %v3795_v8, %v3617_v52  ;;  %v3843_v10 = vadd.f32 %v6309_v24, %v3828_v46  ;;  %v3341_v11 = vadd.f32 %v3324_v33, %v3171_v42 }
 0x2b6   : > { %v4981_v41 = vpop.f32.mrf.mxu1 }
 0x2b7   : > { %v3829_v53 = vadd.f32 %v4981_v41, %v3620_v34  ;;  %v4012_v35 = vadd.f32 %v5004_v15, %v3843_v10  ;;  %v3841_v21 = vadd.f32 %v6309_v24, %v3826_v57  ;;  %v3622_v46 = vadd.f32 %v6301_v9, %v3341_v11 }
 0x2b8   : > { %v3798_v51 = vpop.f32.mrf.mxu1 }
 0x2b9   : > { %v4020_v19 = vmax.f32 %v4012_v35, 0.0  ;;  %v3827_v0 = vadd.f32 %v3798_v51, %v3618_v20  ;;  %v4010_v45 = vadd.f32 %v3979_v26, %v3841_v21  ;;  %v3844_v49 = vadd.f32 %v6309_v24, %v3829_v53 }
 0x2ba   : > { %v4984_v15 = vpop.f32.mrf.mxu1  ;;  %v3624_v26 = vadd.f32 %v6297_v62, %v3343_v18 }
 0x2bb   : > { %4028 = vst [vmem:[%s6318_s14 + $0x10] sm:$0xff] %v4020_v19  ;;  %v4018_v31 = vmax.f32 %v4010_v45, 0.0  ;;  %v4013_v40 = vadd.f32 %v5005_v43, %v3844_v49  ;;  %v3842_v47 = vadd.f32 %v6309_v24, %v3827_v0  ;;  %v3832_v6 = vadd.f32 %v4984_v15, %v3623_v48 }
 0x2bc   : > { %v3811_v3 = vpop.f32.mrf.mxu1 }
 0x2bd   : > { %4026 = vst [vmem:[%s6318_s14] sm:$0xff] %v4018_v31  ;;  %v4021_v50 = vmax.f32 %v4013_v40, 0.0  ;;  %v4011_v39 = vadd.f32 %v3982_v54, %v3842_v47  ;;  %v3830_v37 = vadd.f32 %v3811_v3, %v3621_v28  ;;  %v3847_v59 = vadd.f32 %v6309_v24, %v3832_v6 }
 0x2be   : > { %v4985_v13 = vpop.f32.mrf.mxu1 }
 0x2bf   : > { %4029 = vst [vmem:[%s6318_s14 + $0x18] sm:$0xff] %v4021_v50  ;;  %v4019_v38 = vmax.f32 %v4011_v39, 0.0  ;;  %v3833_v29 = vadd.f32 %v4985_v13, %v3624_v26  ;;  %v3845_v33 = vadd.f32 %v6309_v24, %v3830_v37 }
 0x2c0   : > { %v3814_v44 = vpop.f32.mrf.mxu1 }
 0x2c1   : > { %4027 = vst [vmem:[%s6318_s14 + $0x8] sm:$0xff] %v4019_v38  ;;  %v3831_v16 = vadd.f32 %v3814_v44, %v3622_v46  ;;  %v3848_v10 = vadd.f32 %v6309_v24, %v3833_v29 }
 0x2c3   : > { %v3846_v43 = vadd.f32 %v6309_v24, %v3831_v16 }
 0x2d2   : > { %v5008_v52 = vpop.f32.mrf.mxu1 }
 0x2d3   : > { %v4016_v8 = vadd.f32 %v5008_v52, %v3847_v59 }
 0x2d4   : > { %v3995_v57 = vpop.f32.mrf.mxu1 }
 0x2d5   : > { %v4024_v56 = vmax.f32 %v4016_v8, 0.0  ;;  %v4014_v34 = vadd.f32 %v3995_v57, %v3845_v33 }
 0x2d6   : > { %v5009_v62 = vpop.f32.mrf.mxu1 }
 0x2d7   : > { %4032 = vst [vmem:[%s6318_s14 + $0x30] sm:$0xff] %v4024_v56  ;;  %v4022_v9 = vmax.f32 %v4014_v34, 0.0  ;;  %v4017_v41 = vadd.f32 %v5009_v62, %v3848_v10 }
 0x2d8   : > { %v3998_v53 = vpop.f32.mrf.mxu1 }
 0x2d9   : > { %4030 = vst [vmem:[%s6318_s14 + $0x20] sm:$0xff] %v4022_v9  ;;  %v4025_v35 = vmax.f32 %v4017_v41, 0.0  ;;  %v4015_v20 = vadd.f32 %v3998_v53, %v3846_v43 }
 0x2db   : > { %4033 = vst [vmem:[%s6318_s14 + $0x38] sm:$0xff] %v4025_v35  ;;  %v4023_v21 = vmax.f32 %v4015_v20, 0.0 }
 0x2dd   : > { %4031 = vst [vmem:[%s6318_s14 + $0x28] sm:$0xff] %v4023_v21 }
 0x2de   : > { %5309 = shalt.err (!%p5306_p0)
}
 0x2df   : > { %s5310_s10 = scalar_lea.hbm %s6364_s16, 1024  ;;  %s5314_s12 = scalar_lea.hbm %s6415_s6, 2048 }
 0x2e0   : > { %p5311_p1 = scmp.ne.s32.totalorder %s6364_s16, %s5310_s10  ;;  %p5315_p4 = scmp.lt.s32.totalorder %s6364_s16, %s6415_s6 }
 0x2e1   : > { %p5316_p7 = scmp.lt.s32.totalorder %s5314_s12, %s5310_s10 }
 0x2e2   : > { %p5312_p2 = pnand %p5311_p1, %p5442_p5 }
 0x2e3   : > { %p5317_p6 = por %p5316_p7, %p5315_p4 }
 0x2e4   : > { %p5313_p3 = pneg %p5312_p2 }
 0x2e6   : > { %p5318_p8 = pnand %p5317_p6, %p5313_p3 }
 0x2e8   : > { %5321 = shalt.err (!%p5318_p8)
}
 0x2e9   : > { %s5367_s17 = smov 128   ;;  %s5368_s18 = smov 8  }
 0x2ea   : > { %5031 = dma.vmem_to_hbm [thread:$0]  (%p5442_p5), %s6358_s15, 1024, %s6364_s16, %s6369_s20, %s5367_s17, %s5367_s17, %s5368_s18  }
 0x2eb PF: > { %p5043_p9 = scmp.ge.s32.totalorder %s5360_s24, 2  ;;  %s4063_s19 = sand.u32 1, %s5348_s21  }
 0x2ec   : > { %p6452_p10 = scmp.ne.s32.totalorder %s6420_s8, 0  ;;  %s4064_s25 = scalar_lea.sflag [#allocation5], %s4063_s19 }
 0x2ee   : > { %p5038_p11 = pnand %p5043_p9, %p6452_p10 }
 0x2f0   : > { %p5039_p12 = pneg %p5038_p11 }
 0x2f2   : > { %5343 = dma.done.wait (%p5039_p12), %s4064_s25, 1024  }
 0x2f3   : > { %5345 = vsyncadd (%p5039_p12), %s4064_s25, 4294966272  ;;  %p17_p13 = scmp.ge.s32.totalorder %s5429_s27, 4   ;;  %s6453_s21 = smov %s5352_s22 }
 0x2f4   : > { %s6454_s22 = smov %s5356_s23  ;;  %s6455_s23 = smov %s5440_s30 }
 0x2f5   : > { %s6456_s24 = smov %s5429_s27  ;;  %19 = sbr.rel (!%p17_p13) target bundleno = 4 (0x4), region = 87 }
 0x2fa   :  { %4069 = vsyncpa [#allocation4], 1 }
 0x2fb   :  { %4071 = vsyncpa [#allocation4 + $0x1], 1 }
 0x2fc   :  { %4072 = vsyncpa [#allocation5], 1 }
 0x2fd   :  { %4074 = vsyncpa [#allocation5 + $0x1], 1 }

</bundles_post_ra>
